<compile_context>
chip_gen: v7x
topology: tpu7x:2x2x1
jax: 0.10.0
libtpu: 0.0.40
codegen_flags: <defaults>
</compile_context>

<pallas_src>
import jax
import jax.numpy as jnp
from jax import lax
from jax.experimental import pallas as pl
from jax.experimental.pallas import tpu as pltpu


def _round_up(x, m):
    return (x + m - 1) // m * m


# Resident weights have a constant index map -> 1 buffer is enough (halves
# their VMEM footprint; matters on v7x's 64 MiB VMEM at large hidden sizes).
_SINGLE_BUFFER_WEIGHTS = hasattr(pl, "Buffered")
_WEIGHT_BUFS = 1 if _SINGLE_BUFFER_WEIGHTS else 2


def _vmem_capacity_bytes():
    """Physical VMEM per TensorCore (v5e/v6e: 128 MiB, v7x: 64 MiB)."""
    try:
        return int(pltpu.get_tpu_info().vmem_capacity_bytes)
    except Exception:
        return 64 << 20  # conservative fallback (v7x per-core)


def _choose_time_block(seq_len, b_blk, h_p, num_layers, w_bytes, z_bytes, vmem_cap):
    """Largest time block whose streamed slabs fit next to the resident weights."""
    resident = (2 * num_layers - 1) * h_p * h_p * w_bytes * _WEIGHT_BUFS   # weights
    resident += max(num_layers - 1, 0) * h_p * 4 * _WEIGHT_BUFS            # biases
    resident += num_layers * b_blk * h_p * 4 * 2                           # hidden carry
    per_step = b_blk * h_p * (z_bytes + 4) * 2                             # z0 in + out, dbl-buf
    avail = int(vmem_cap * 0.7) - resident - (4 << 20)                     # headroom
    t = max(1, avail // per_step)
    t = int(min(t, seq_len, 128))
    # Prefer an exact divisor of seq_len (no tail masking) unless it costs >2x;
    # otherwise keep the big block and pad+mask the tail.
    best_div = max(d for d in range(1, t + 1) if seq_len % d == 0)
    return best_div if 2 * best_div >= t else t


def _make_rnn_kernel(num_layers, t_blk, seq_len, mm_dtype, mask_tail, unroll):
    """Kernel body for static layer count / time-block size / dtype."""

    def kernel(z0_ref, whh0_ref, *refs):
        n_rest = num_layers - 1
        out_ref = refs[3 * n_rest]
        hid_ref = refs[3 * n_rest + 1]

        tb = pl.program_id(1)

        # PyTorch: hidden=None -> zeros.  hid block has a constant time index,
        # so it stays VMEM-resident across the sequential time grid (carry).
        @pl.when(tb == 0)
        def _():
            hid_ref[...] = jnp.zeros_like(hid_ref)

        # Hoisted once per grid block (JAX does not CSE repeated ref loads /
        # bias broadcasts inside the unrolled time loop).
        whh0 = whh0_ref[...]
        w_ih = [refs[3 * l][...] for l in range(n_rest)]
        w_hh = [refs[3 * l + 1][...] for l in range(n_rest)]
        bias = [refs[3 * l + 2][...] for l in range(n_rest)]

        # Per-layer hidden states carried in registers across the time block:
        # one VMEM read here + one write after the loop, not per timestep.
        h_init = tuple(hid_ref[l] for l in range(num_layers))

        def step(t, hs):
            # Layer 0: input projection + both biases were hoisted to the
            # wrapper (z0 slab); only the recurrent GEMM sits on the serial path.
            x = jnp.tanh(
                z0_ref[t].astype(jnp.float32)
                + jnp.dot(hs[0].astype(mm_dtype), whh0,
                          preferred_element_type=jnp.float32))
            new_hs = [x]
            # Layers >= 1: two bf16 dots summed (no lane concat copy).
            for l in range(1, num_layers):
                x = jnp.tanh(
                    jnp.dot(x.astype(mm_dtype), w_ih[l - 1],
                            preferred_element_type=jnp.float32)
                    + jnp.dot(hs[l].astype(mm_dtype), w_hh[l - 1],
                              preferred_element_type=jnp.float32)
                    + bias[l - 1])
                new_hs.append(x)
            if mask_tail:
                # Padded tail timesteps must not advance the carry.
                valid = (tb * t_blk + t) < seq_len
                new_hs = [jnp.where(valid, n, o) for n, o in zip(new_hs, hs)]
            out_ref[t] = x.astype(out_ref.dtype)  # padded rows sliced off later
            return tuple(new_hs)

        h_fin = lax.fori_loop(0, t_blk, step, h_init, unroll=unroll)
        for l in range(num_layers):
            hid_ref[l] = h_fin[l]

    return kernel


def multilayer_rnn_forward(x_bsd, params, *, matmul_dtype=jnp.bfloat16,
                           time_block=None, batch_block=None):
    """Run the multi-layer tanh RNN.

    Args:
      x_bsd:  (batch, seq, input_size) float32, PyTorch layout.
      params: list of (W_ih, b_ih, W_hh, b_hh) per layer, nn.Linear convention.
      matmul_dtype: dtype of MXU operands (bf16 fast path, f32 validation path).

    Returns:
      output: (batch, seq, hidden) -- same (scrambled) layout as the PyTorch
                                      module's cat(dim=0)+view.
      hidden: (batch, num_layers, hidden)
    """
    bs, seq_len, input_size = x_bsd.shape
    num_layers = len(params)
    hidden_size = params[0][0].shape[0]
    f32 = jnp.float32
    w_bytes = jnp.dtype(matmul_dtype).itemsize

    bs_p = _round_up(bs, 8)            # sublane-dense batch
    h_p = _round_up(hidden_size, 128)  # lane-dense hidden

    # Batch tile: keep the whole batch in one block up to the MXU row count,
    # then split; multiple batch blocks are sharded over v7x's two TensorCores
    # via the "parallel" grid axis.
    if batch_block is None:
        batch_block = bs_p if bs_p <= 256 else 256
    b_blk = _round_up(min(batch_block, bs_p), 8)
    bs_p = _round_up(bs_p, b_blk)
    n_b = bs_p // b_blk

    vmem_cap = _vmem_capacity_bytes()
    if time_block is None:
        time_block = _choose_time_block(seq_len, b_blk, h_p, num_layers,
                                        w_bytes, w_bytes, vmem_cap)
    t_blk = max(1, int(time_block))
    seq_p = _round_up(seq_len, t_blk)
    n_tb = seq_p // t_blk
    mask_tail = seq_p != seq_len

    pad_h = h_p - hidden_size
    pad_b = bs_p - bs

    # ---- hoisted layer-0 input projection (one big GEMM, off the recurrence) ----
    w_ih0, b_ih0, w_hh0, b_hh0 = params[0]
    w0 = jnp.asarray(w_ih0, f32).T                                      # (in, hidden)
    b0 = (jnp.asarray(b_ih0, f32) + jnp.asarray(b_hh0, f32))[None, :]   # (1, hidden)
    x_tbd = jnp.transpose(jnp.asarray(x_bsd, f32), (1, 0, 2))           # (seq, bs, in)
    z0 = jnp.einsum("tbi,ih->tbh", x_tbd, w0) + b0                      # (seq, bs, hidden)
    z0 = jnp.pad(z0, ((0, seq_p - seq_len), (0, pad_b), (0, pad_h)))
    z0 = z0.astype(matmul_dtype)          # streamed slab: halved HBM bytes in bf16

    # Layer-0 recurrent weight: pre-transposed + zero-padded (padded lanes stay 0).
    whh0 = jnp.pad(jnp.asarray(w_hh0, f32).T,
                   ((0, pad_h), (0, pad_h))).astype(matmul_dtype)       # (h_p, h_p)

    # Layers >= 1: separate padded input/recurrent weights (two-dot form) + bias.
    layer_arrays = []
    for (w_ih, b_ih, w_hh, b_hh) in params[1:]:
        w_ih_p = jnp.pad(jnp.asarray(w_ih, f32).T,
                         ((0, pad_h), (0, pad_h))).astype(matmul_dtype)
        w_hh_p = jnp.pad(jnp.asarray(w_hh, f32).T,
                         ((0, pad_h), (0, pad_h))).astype(matmul_dtype)
        b = jnp.pad((jnp.asarray(b_ih, f32) + jnp.asarray(b_hh, f32))[None, :],
                    ((0, 0), (0, pad_h)))                               # f32 (1, h_p)
        layer_arrays.extend([w_ih_p, w_hh_p, b])

    # ---- specs ----
    def _resident_spec(shape):
        idx_map = lambda b, tb, _n=len(shape): (0,) * _n
        if _SINGLE_BUFFER_WEIGHTS:
            try:
                return pl.BlockSpec(shape, idx_map, pipeline_mode=pl.Buffered(1))
            except Exception:
                pass
        return pl.BlockSpec(shape, idx_map)

    in_specs = [
        pl.BlockSpec((t_blk, b_blk, h_p), lambda b, tb: (tb, b, 0)),   # z0 slab
        _resident_spec(whh0.shape),                                     # W_hh0
    ]
    flat_inputs = [z0, whh0]
    for arr in layer_arrays:
        in_specs.append(_resident_spec(arr.shape))
        flat_inputs.append(arr)

    out_specs = (
        # last-layer output, time-major, lane-dense (h_p >= 128)
        pl.BlockSpec((t_blk, b_blk, h_p), lambda b, tb: (tb, b, 0)),
        # hidden carry: constant block over the time axis -> VMEM-resident
        pl.BlockSpec((num_layers, b_blk, h_p), lambda b, tb: (0, b, 0)),
    )
    out_shape = (
        jax.ShapeDtypeStruct((seq_p, bs_p, h_p), f32),
        jax.ShapeDtypeStruct((num_layers, bs_p, h_p), f32),
    )

    unroll = min(t_blk, 8)   # bounded unroll keeps vreg pressure sane
    kernel = _make_rnn_kernel(num_layers, t_blk, seq_len, matmul_dtype,
                              mask_tail, unroll)

    out_tbh, hid_lbh = pl.pallas_call(
        kernel,
        out_shape=out_shape,
        grid_spec=pltpu.PrefetchScalarGridSpec(
            num_scalar_prefetch=0,
            grid=(n_b, n_tb),
            in_specs=in_specs,
            out_specs=out_specs,
        ),
        compiler_params=pltpu.CompilerParams(
            # batch blocks are independent; time axis is a recurrence
            dimension_semantics=("parallel", "arbitrary"),
            vmem_limit_bytes=int(vmem_cap * 0.85),
        ),
    )(*flat_inputs)

    # Strip padding, then reproduce torch.cat(outputs, dim=0).view(bs, seq, h):
    # row-major flatten of the (seq, bs, hidden) slab IS the cat along dim=0.
    out_tbh = out_tbh[:seq_len, :bs, :hidden_size]
    output = jnp.reshape(out_tbh, (bs, seq_len, hidden_size))
    hidden = jnp.transpose(hid_lbh[:, :bs, :hidden_size], (1, 0, 2))
    return output, hidden


def _reference_forward(x_bsd, params):
    """Pure-JAX reference mirroring the PyTorch module line by line."""
    bs, seq_len, _ = x_bsd.shape
    num_layers = len(params)
    hidden_size = params[0][0].shape[0]
    hidden = jnp.zeros((bs, num_layers, hidden_size), jnp.float32)
    outputs = []
    for t in range(seq_len):
        x_t = x_bsd[:, t, :]
        for l, (w_ih, b_ih, w_hh, b_hh) in enumerate(params):
            hy = jnp.tanh(x_t @ w_ih.T + b_ih + hidden[:, l] @ w_hh.T + b_hh)
            hidden = hidden.at[:, l].set(hy)
            x_t = hy
        outputs.append(x_t)
    out = jnp.concatenate(outputs, axis=0).reshape(bs, seq_len, hidden_size)
    return out, hidden


def _init_params(key, input_size, hidden_size, num_layers):
    """Deterministic synthetic parameters matching nn.Linear shapes."""
    params = []
    for i in range(num_layers):
        in_sz = input_size if i == 0 else hidden_size
        key, k1, k2, k3, k4 = jax.random.split(key, 5)
        s_ih = 1.0 / jnp.sqrt(in_sz)
        s_hh = 1.0 / jnp.sqrt(hidden_size)
        w_ih = jax.random.uniform(k1, (hidden_size, in_sz), jnp.float32, -s_ih, s_ih)
        b_ih = jax.random.uniform(k2, (hidden_size,), jnp.float32, -s_ih, s_ih)
        w_hh = jax.random.uniform(k3, (hidden_size, hidden_size), jnp.float32, -s_hh, s_hh)
        b_hh = jax.random.uniform(k4, (hidden_size,), jnp.float32, -s_hh, s_hh)
        params.append((w_ih, b_ih, w_hh, b_hh))
    return params


if __name__ == "__main__":
    key = jax.random.PRNGKey(0)
    k_x, k_p, k_x2, k_p2 = jax.random.split(key, 4)

    # --- Config A: default bf16 MXU fast path ------------------------------
    batch, seq, in_sz, hid_sz, n_layers = 4, 8, 32, 32, 2
    x = jax.random.normal(k_x, (batch, seq, in_sz), jnp.float32)
    params = _init_params(k_p, in_sz, hid_sz, n_layers)

    out, hid = jax.block_until_ready(multilayer_rnn_forward(x, params))
    ref_out, ref_hid = _reference_forward(x, params)
    assert out.shape == (batch, seq, hid_sz)
    assert hid.shape == (batch, n_layers, hid_sz)
    # bf16 matmul operands through a recurrence -> relaxed tolerance.
    assert jnp.allclose(out, ref_out, rtol=5e-2, atol=5e-2)
    assert jnp.allclose(hid, ref_hid, rtol=5e-2, atol=5e-2)

    # --- Config A': f32 matmul validation path (tight tolerance) -----------
    out32, hid32 = jax.block_until_ready(
        multilayer_rnn_forward(x, params, matmul_dtype=jnp.float32))
    assert jnp.allclose(out32, ref_out, rtol=1e-4, atol=1e-4)
    assert jnp.allclose(hid32, ref_hid, rtol=1e-4, atol=1e-4)

    # --- Config B: multi-batch-block ("parallel" axis), 3 layers, and the
    # padded-tail time-masking path (seq=10, time_block=4 -> seq padded to 12).
    batch2, seq2, in2, hid2, nl2 = 12, 10, 48, 32, 3
    x2 = jax.random.normal(k_x2, (batch2, seq2, in2), jnp.float32)
    params2 = _init_params(k_p2, in2, hid2, nl2)
    out2, hidden2 = jax.block_until_ready(
        multilayer_rnn_forward(x2, params2, time_block=4, batch_block=8))
    r_out2, r_hid2 = _reference_forward(x2, params2)
    assert out2.shape == (batch2, seq2, hid2)
    assert hidden2.shape == (batch2, nl2, hid2)
    assert jnp.allclose(out2, r_out2, rtol=5e-2, atol=5e-2)
    assert jnp.allclose(hidden2, r_hid2, rtol=5e-2, atol=5e-2)

    print("KERNEL_OK")
</pallas_src>

<mosaic_0001>
module attributes {stable_mosaic.version = 11 : i64} {
  func.func @kernel(%arg0: i32, %arg1: i32, %arg2: memref<8x8x128xbf16, #tpu.memory_space<vmem>>, %arg3: memref<128x128xbf16, #tpu.memory_space<vmem>>, %arg4: memref<128x128xbf16, #tpu.memory_space<vmem>>, %arg5: memref<128x128xbf16, #tpu.memory_space<vmem>>, %arg6: memref<1x128xf32, #tpu.memory_space<vmem>>, %arg7: memref<8x8x128xf32, #tpu.memory_space<vmem>>, %arg8: memref<2x8x128xf32, #tpu.memory_space<vmem>>) attributes {dimension_semantics = [#tpu.dimension_semantics<parallel>, #tpu.dimension_semantics<arbitrary>], iteration_bounds = array<i64: 1, 1>, scalar_prefetch = 0 : i64, scratch_operands = 0 : i64, tpu.core_type = #tpu.core_type<tc>, window_params = [{transform_indices = @transform_0, window_bounds = array<i64: 8, 8, 128>}, {pipeline_mode = #tpu.pipeline_mode<synchronous>, transform_indices = @transform_1, window_bounds = array<i64: 128, 128>}, {pipeline_mode = #tpu.pipeline_mode<synchronous>, transform_indices = @transform_2, window_bounds = array<i64: 128, 128>}, {pipeline_mode = #tpu.pipeline_mode<synchronous>, transform_indices = @transform_3, window_bounds = array<i64: 128, 128>}, {pipeline_mode = #tpu.pipeline_mode<synchronous>, transform_indices = @transform_4, window_bounds = array<i64: 1, 128>}, {transform_indices = @transform_5, window_bounds = array<i64: 8, 8, 128>}, {transform_indices = @transform_6, window_bounds = array<i64: 2, 8, 128>}]} {
    %c0_i32 = arith.constant 0 : i32
    %0 = arith.cmpi eq, %arg1, %c0_i32 : i32
    %1 = arith.extui %0 : i1 to i32
    %c0_i32_0 = arith.constant 0 : i32
    %2 = arith.cmpi ne, %1, %c0_i32_0 : i32
    scf.if %2 {
      %cst_75 = arith.constant 0.000000e+00 : f32
      %177 = vector.broadcast %cst_75 : f32 to vector<2x8x128xf32>
      %c0_76 = arith.constant 0 : index
      %c0_77 = arith.constant 0 : index
      %c0_78 = arith.constant 0 : index
      %178 = vector.load %arg8[%c0_76, %c0_77, %c0_78] : memref<2x8x128xf32, #tpu.memory_space<vmem>>, vector<2x8x128xf32>
      tpu.vector_store %arg8[%c0_76, %c0_77, %c0_78], %177 {strides = array<i32>} : memref<2x8x128xf32, #tpu.memory_space<vmem>>, vector<2x8x128xf32>,
    } else {
    }
    %c0 = arith.constant 0 : index
    %c0_1 = arith.constant 0 : index
    %3 = vector.load %arg3[%c0, %c0_1] : memref<128x128xbf16, #tpu.memory_space<vmem>>, vector<128x128xbf16>
    %c0_2 = arith.constant 0 : index
    %c0_3 = arith.constant 0 : index
    %4 = vector.load %arg4[%c0_2, %c0_3] : memref<128x128xbf16, #tpu.memory_space<vmem>>, vector<128x128xbf16>
    %c0_4 = arith.constant 0 : index
    %c0_5 = arith.constant 0 : index
    %5 = vector.load %arg5[%c0_4, %c0_5] : memref<128x128xbf16, #tpu.memory_space<vmem>>, vector<128x128xbf16>
    %c0_6 = arith.constant 0 : index
    %c0_7 = arith.constant 0 : index
    %6 = vector.load %arg6[%c0_6, %c0_7] : memref<1x128xf32, #tpu.memory_space<vmem>>, vector<1x128xf32>
    %c0_8 = arith.constant 0 : index
    %c0_9 = arith.constant 0 : index
    %c0_10 = arith.constant 0 : index
    %7 = vector.load %arg8[%c0_8, %c0_9, %c0_10] : memref<2x8x128xf32, #tpu.memory_space<vmem>>, vector<1x8x128xf32>
    %8 = vector.shape_cast %7 : vector<1x8x128xf32> to vector<8x128xf32>
    %c1 = arith.constant 1 : index
    %c0_11 = arith.constant 0 : index
    %c0_12 = arith.constant 0 : index
    %9 = vector.load %arg8[%c1, %c0_11, %c0_12] : memref<2x8x128xf32, #tpu.memory_space<vmem>>, vector<1x8x128xf32>
    %10 = vector.shape_cast %9 : vector<1x8x128xf32> to vector<8x128xf32>
    %c0_i32_13 = arith.constant 0 : i32
    %11 = arith.index_cast %c0_i32_13 : i32 to index
    %c0_14 = arith.constant 0 : index
    %c0_15 = arith.constant 0 : index
    %12 = vector.load %arg2[%11, %c0_14, %c0_15] : memref<8x8x128xbf16, #tpu.memory_space<vmem>>, vector<1x8x128xbf16>
    %13 = vector.shape_cast %12 : vector<1x8x128xbf16> to vector<8x128xbf16>
    %14 = arith.extf %13 : vector<8x128xbf16> to vector<8x128xf32>
    %15 = arith.truncf %8 : vector<8x128xf32> to vector<8x128xbf16>
    %cst = arith.constant dense<0.000000e+00> : vector<8x128xf32>
    %16 = tpu.matmul %15, %3, %cst {dimension_numbers = #tpu.dot_dimension_numbers<[1], [0], [0], [1], [0, 0, 1, 1], [], []>} : vector<8x128xbf16>, vector<128x128xbf16>, vector<8x128xf32> -> vector<8x128xf32>
    %17 = arith.addf %14, %16 : vector<8x128xf32>
    %18 = math.tanh %17 : vector<8x128xf32>
    %19 = arith.truncf %18 : vector<8x128xf32> to vector<8x128xbf16>
    %cst_16 = arith.constant dense<0.000000e+00> : vector<8x128xf32>
    %20 = tpu.matmul %19, %4, %cst_16 {dimension_numbers = #tpu.dot_dimension_numbers<[1], [0], [0], [1], [0, 0, 1, 1], [], []>} : vector<8x128xbf16>, vector<128x128xbf16>, vector<8x128xf32> -> vector<8x128xf32>
    %21 = arith.truncf %10 : vector<8x128xf32> to vector<8x128xbf16>
    %cst_17 = arith.constant dense<0.000000e+00> : vector<8x128xf32>
    %22 = tpu.matmul %21, %5, %cst_17 {dimension_numbers = #tpu.dot_dimension_numbers<[1], [0], [0], [1], [0, 0, 1, 1], [], []>} : vector<8x128xbf16>, vector<128x128xbf16>, vector<8x128xf32> -> vector<8x128xf32>
    %23 = arith.addf %20, %22 : vector<8x128xf32>
    %24 = vector.broadcast %6 : vector<1x128xf32> to vector<8x128xf32>
    %25 = arith.addf %23, %24 : vector<8x128xf32>
    %26 = math.tanh %25 : vector<8x128xf32>
    %27 = arith.index_cast %c0_i32_13 : i32 to index
    %c0_18 = arith.constant 0 : index
    %c0_19 = arith.constant 0 : index
    %28 = vector.load %arg7[%27, %c0_18, %c0_19] : memref<8x8x128xf32, #tpu.memory_space<vmem>>, vector<1x8x128xf32>
    %29 = vector.shape_cast %28 : vector<1x8x128xf32> to vector<8x128xf32>
    %30 = vector.shape_cast %26 : vector<8x128xf32> to vector<1x8x128xf32>
    tpu.vector_store %arg7[%27, %c0_18, %c0_19], %30 {strides = array<i32>} : memref<8x8x128xf32, #tpu.memory_space<vmem>>, vector<1x8x128xf32>,
    %c1_i32 = arith.constant 1 : i32
    %31 = arith.index_cast %c1_i32 : i32 to index
    %c0_20 = arith.constant 0 : index
    %c0_21 = arith.constant 0 : index
    %32 = vector.load %arg2[%31, %c0_20, %c0_21] : memref<8x8x128xbf16, #tpu.memory_space<vmem>>, vector<1x8x128xbf16>
    %33 = vector.shape_cast %32 : vector<1x8x128xbf16> to vector<8x128xbf16>
    %34 = arith.extf %33 : vector<8x128xbf16> to vector<8x128xf32>
    %35 = arith.truncf %18 : vector<8x128xf32> to vector<8x128xbf16>
    %cst_22 = arith.constant dense<0.000000e+00> : vector<8x128xf32>
    %36 = tpu.matmul %35, %3, %cst_22 {dimension_numbers = #tpu.dot_dimension_numbers<[1], [0], [0], [1], [0, 0, 1, 1], [], []>} : vector<8x128xbf16>, vector<128x128xbf16>, vector<8x128xf32> -> vector<8x128xf32>
    %37 = arith.addf %34, %36 : vector<8x128xf32>
    %38 = math.tanh %37 : vector<8x128xf32>
    %39 = arith.truncf %38 : vector<8x128xf32> to vector<8x128xbf16>
    %cst_23 = arith.constant dense<0.000000e+00> : vector<8x128xf32>
    %40 = tpu.matmul %39, %4, %cst_23 {dimension_numbers = #tpu.dot_dimension_numbers<[1], [0], [0], [1], [0, 0, 1, 1], [], []>} : vector<8x128xbf16>, vector<128x128xbf16>, vector<8x128xf32> -> vector<8x128xf32>
    %41 = arith.truncf %26 : vector<8x128xf32> to vector<8x128xbf16>
    %cst_24 = arith.constant dense<0.000000e+00> : vector<8x128xf32>
    %42 = tpu.matmul %41, %5, %cst_24 {dimension_numbers = #tpu.dot_dimension_numbers<[1], [0], [0], [1], [0, 0, 1, 1], [], []>} : vector<8x128xbf16>, vector<128x128xbf16>, vector<8x128xf32> -> vector<8x128xf32>
    %43 = arith.addf %40, %42 : vector<8x128xf32>
    %44 = vector.broadcast %6 : vector<1x128xf32> to vector<8x128xf32>
    %45 = arith.addf %43, %44 : vector<8x128xf32>
    %46 = math.tanh %45 : vector<8x128xf32>
    %47 = arith.index_cast %c1_i32 : i32 to index
    %c0_25 = arith.constant 0 : index
    %c0_26 = arith.constant 0 : index
    %48 = vector.load %arg7[%47, %c0_25, %c0_26] : memref<8x8x128xf32, #tpu.memory_space<vmem>>, vector<1x8x128xf32>
    %49 = vector.shape_cast %48 : vector<1x8x128xf32> to vector<8x128xf32>
    %50 = vector.shape_cast %46 : vector<8x128xf32> to vector<1x8x128xf32>
    tpu.vector_store %arg7[%47, %c0_25, %c0_26], %50 {strides = array<i32>} : memref<8x8x128xf32, #tpu.memory_space<vmem>>, vector<1x8x128xf32>,
    %c2_i32 = arith.constant 2 : i32
    %51 = arith.index_cast %c2_i32 : i32 to index
    %c0_27 = arith.constant 0 : index
    %c0_28 = arith.constant 0 : index
    %52 = vector.load %arg2[%51, %c0_27, %c0_28] : memref<8x8x128xbf16, #tpu.memory_space<vmem>>, vector<1x8x128xbf16>
    %53 = vector.shape_cast %52 : vector<1x8x128xbf16> to vector<8x128xbf16>
    %54 = arith.extf %53 : vector<8x128xbf16> to vector<8x128xf32>
    %55 = arith.truncf %38 : vector<8x128xf32> to vector<8x128xbf16>
    %cst_29 = arith.constant dense<0.000000e+00> : vector<8x128xf32>
    %56 = tpu.matmul %55, %3, %cst_29 {dimension_numbers = #tpu.dot_dimension_numbers<[1], [0], [0], [1], [0, 0, 1, 1], [], []>} : vector<8x128xbf16>, vector<128x128xbf16>, vector<8x128xf32> -> vector<8x128xf32>
    %57 = arith.addf %54, %56 : vector<8x128xf32>
    %58 = math.tanh %57 : vector<8x128xf32>
    %59 = arith.truncf %58 : vector<8x128xf32> to vector<8x128xbf16>
    %cst_30 = arith.constant dense<0.000000e+00> : vector<8x128xf32>
    %60 = tpu.matmul %59, %4, %cst_30 {dimension_numbers = #tpu.dot_dimension_numbers<[1], [0], [0], [1], [0, 0, 1, 1], [], []>} : vector<8x128xbf16>, vector<128x128xbf16>, vector<8x128xf32> -> vector<8x128xf32>
    %61 = arith.truncf %46 : vector<8x128xf32> to vector<8x128xbf16>
    %cst_31 = arith.constant dense<0.000000e+00> : vector<8x128xf32>
    %62 = tpu.matmul %61, %5, %cst_31 {dimension_numbers = #tpu.dot_dimension_numbers<[1], [0], [0], [1], [0, 0, 1, 1], [], []>} : vector<8x128xbf16>, vector<128x128xbf16>, vector<8x128xf32> -> vector<8x128xf32>
    %63 = arith.addf %60, %62 : vector<8x128xf32>
    %64 = vector.broadcast %6 : vector<1x128xf32> to vector<8x128xf32>
    %65 = arith.addf %63, %64 : vector<8x128xf32>
    %66 = math.tanh %65 : vector<8x128xf32>
    %67 = arith.index_cast %c2_i32 : i32 to index
    %c0_32 = arith.constant 0 : index
    %c0_33 = arith.constant 0 : index
    %68 = vector.load %arg7[%67, %c0_32, %c0_33] : memref<8x8x128xf32, #tpu.memory_space<vmem>>, vector<1x8x128xf32>
    %69 = vector.shape_cast %68 : vector<1x8x128xf32> to vector<8x128xf32>
    %70 = vector.shape_cast %66 : vector<8x128xf32> to vector<1x8x128xf32>
    tpu.vector_store %arg7[%67, %c0_32, %c0_33], %70 {strides = array<i32>} : memref<8x8x128xf32, #tpu.memory_space<vmem>>, vector<1x8x128xf32>,
    %c3_i32 = arith.constant 3 : i32
    %71 = arith.index_cast %c3_i32 : i32 to index
    %c0_34 = arith.constant 0 : index
    %c0_35 = arith.constant 0 : index
    %72 = vector.load %arg2[%71, %c0_34, %c0_35] : memref<8x8x128xbf16, #tpu.memory_space<vmem>>, vector<1x8x128xbf16>
    %73 = vector.shape_cast %72 : vector<1x8x128xbf16> to vector<8x128xbf16>
    %74 = arith.extf %73 : vector<8x128xbf16> to vector<8x128xf32>
    %75 = arith.truncf %58 : vector<8x128xf32> to vector<8x128xbf16>
    %cst_36 = arith.constant dense<0.000000e+00> : vector<8x128xf32>
    %76 = tpu.matmul %75, %3, %cst_36 {dimension_numbers = #tpu.dot_dimension_numbers<[1], [0], [0], [1], [0, 0, 1, 1], [], []>} : vector<8x128xbf16>, vector<128x128xbf16>, vector<8x128xf32> -> vector<8x128xf32>
    %77 = arith.addf %74, %76 : vector<8x128xf32>
    %78 = math.tanh %77 : vector<8x128xf32>
    %79 = arith.truncf %78 : vector<8x128xf32> to vector<8x128xbf16>
    %cst_37 = arith.constant dense<0.000000e+00> : vector<8x128xf32>
    %80 = tpu.matmul %79, %4, %cst_37 {dimension_numbers = #tpu.dot_dimension_numbers<[1], [0], [0], [1], [0, 0, 1, 1], [], []>} : vector<8x128xbf16>, vector<128x128xbf16>, vector<8x128xf32> -> vector<8x128xf32>
    %81 = arith.truncf %66 : vector<8x128xf32> to vector<8x128xbf16>
    %cst_38 = arith.constant dense<0.000000e+00> : vector<8x128xf32>
    %82 = tpu.matmul %81, %5, %cst_38 {dimension_numbers = #tpu.dot_dimension_numbers<[1], [0], [0], [1], [0, 0, 1, 1], [], []>} : vector<8x128xbf16>, vector<128x128xbf16>, vector<8x128xf32> -> vector<8x128xf32>
    %83 = arith.addf %80, %82 : vector<8x128xf32>
    %84 = vector.broadcast %6 : vector<1x128xf32> to vector<8x128xf32>
    %85 = arith.addf %83, %84 : vector<8x128xf32>
    %86 = math.tanh %85 : vector<8x128xf32>
    %87 = arith.index_cast %c3_i32 : i32 to index
    %c0_39 = arith.constant 0 : index
    %c0_40 = arith.constant 0 : index
    %88 = vector.load %arg7[%87, %c0_39, %c0_40] : memref<8x8x128xf32, #tpu.memory_space<vmem>>, vector<1x8x128xf32>
    %89 = vector.shape_cast %88 : vector<1x8x128xf32> to vector<8x128xf32>
    %90 = vector.shape_cast %86 : vector<8x128xf32> to vector<1x8x128xf32>
    tpu.vector_store %arg7[%87, %c0_39, %c0_40], %90 {strides = array<i32>} : memref<8x8x128xf32, #tpu.memory_space<vmem>>, vector<1x8x128xf32>,
    %c4_i32 = arith.constant 4 : i32
    %91 = arith.index_cast %c4_i32 : i32 to index
    %c0_41 = arith.constant 0 : index
    %c0_42 = arith.constant 0 : index
    %92 = vector.load %arg2[%91, %c0_41, %c0_42] : memref<8x8x128xbf16, #tpu.memory_space<vmem>>, vector<1x8x128xbf16>
    %93 = vector.shape_cast %92 : vector<1x8x128xbf16> to vector<8x128xbf16>
    %94 = arith.extf %93 : vector<8x128xbf16> to vector<8x128xf32>
    %95 = arith.truncf %78 : vector<8x128xf32> to vector<8x128xbf16>
    %cst_43 = arith.constant dense<0.000000e+00> : vector<8x128xf32>
    %96 = tpu.matmul %95, %3, %cst_43 {dimension_numbers = #tpu.dot_dimension_numbers<[1], [0], [0], [1], [0, 0, 1, 1], [], []>} : vector<8x128xbf16>, vector<128x128xbf16>, vector<8x128xf32> -> vector<8x128xf32>
    %97 = arith.addf %94, %96 : vector<8x128xf32>
    %98 = math.tanh %97 : vector<8x128xf32>
    %99 = arith.truncf %98 : vector<8x128xf32> to vector<8x128xbf16>
    %cst_44 = arith.constant dense<0.000000e+00> : vector<8x128xf32>
    %100 = tpu.matmul %99, %4, %cst_44 {dimension_numbers = #tpu.dot_dimension_numbers<[1], [0], [0], [1], [0, 0, 1, 1], [], []>} : vector<8x128xbf16>, vector<128x128xbf16>, vector<8x128xf32> -> vector<8x128xf32>
    %101 = arith.truncf %86 : vector<8x128xf32> to vector<8x128xbf16>
    %cst_45 = arith.constant dense<0.000000e+00> : vector<8x128xf32>
    %102 = tpu.matmul %101, %5, %cst_45 {dimension_numbers = #tpu.dot_dimension_numbers<[1], [0], [0], [1], [0, 0, 1, 1], [], []>} : vector<8x128xbf16>, vector<128x128xbf16>, vector<8x128xf32> -> vector<8x128xf32>
    %103 = arith.addf %100, %102 : vector<8x128xf32>
    %104 = vector.broadcast %6 : vector<1x128xf32> to vector<8x128xf32>
    %105 = arith.addf %103, %104 : vector<8x128xf32>
    %106 = math.tanh %105 : vector<8x128xf32>
    %107 = arith.index_cast %c4_i32 : i32 to index
    %c0_46 = arith.constant 0 : index
    %c0_47 = arith.constant 0 : index
    %108 = vector.load %arg7[%107, %c0_46, %c0_47] : memref<8x8x128xf32, #tpu.memory_space<vmem>>, vector<1x8x128xf32>
    %109 = vector.shape_cast %108 : vector<1x8x128xf32> to vector<8x128xf32>
    %110 = vector.shape_cast %106 : vector<8x128xf32> to vector<1x8x128xf32>
    tpu.vector_store %arg7[%107, %c0_46, %c0_47], %110 {strides = array<i32>} : memref<8x8x128xf32, #tpu.memory_space<vmem>>, vector<1x8x128xf32>,
    %c5_i32 = arith.constant 5 : i32
    %111 = arith.index_cast %c5_i32 : i32 to index
    %c0_48 = arith.constant 0 : index
    %c0_49 = arith.constant 0 : index
    %112 = vector.load %arg2[%111, %c0_48, %c0_49] : memref<8x8x128xbf16, #tpu.memory_space<vmem>>, vector<1x8x128xbf16>
    %113 = vector.shape_cast %112 : vector<1x8x128xbf16> to vector<8x128xbf16>
    %114 = arith.extf %113 : vector<8x128xbf16> to vector<8x128xf32>
    %115 = arith.truncf %98 : vector<8x128xf32> to vector<8x128xbf16>
    %cst_50 = arith.constant dense<0.000000e+00> : vector<8x128xf32>
    %116 = tpu.matmul %115, %3, %cst_50 {dimension_numbers = #tpu.dot_dimension_numbers<[1], [0], [0], [1], [0, 0, 1, 1], [], []>} : vector<8x128xbf16>, vector<128x128xbf16>, vector<8x128xf32> -> vector<8x128xf32>
    %117 = arith.addf %114, %116 : vector<8x128xf32>
    %118 = math.tanh %117 : vector<8x128xf32>
    %119 = arith.truncf %118 : vector<8x128xf32> to vector<8x128xbf16>
    %cst_51 = arith.constant dense<0.000000e+00> : vector<8x128xf32>
    %120 = tpu.matmul %119, %4, %cst_51 {dimension_numbers = #tpu.dot_dimension_numbers<[1], [0], [0], [1], [0, 0, 1, 1], [], []>} : vector<8x128xbf16>, vector<128x128xbf16>, vector<8x128xf32> -> vector<8x128xf32>
    %121 = arith.truncf %106 : vector<8x128xf32> to vector<8x128xbf16>
    %cst_52 = arith.constant dense<0.000000e+00> : vector<8x128xf32>
    %122 = tpu.matmul %121, %5, %cst_52 {dimension_numbers = #tpu.dot_dimension_numbers<[1], [0], [0], [1], [0, 0, 1, 1], [], []>} : vector<8x128xbf16>, vector<128x128xbf16>, vector<8x128xf32> -> vector<8x128xf32>
    %123 = arith.addf %120, %122 : vector<8x128xf32>
    %124 = vector.broadcast %6 : vector<1x128xf32> to vector<8x128xf32>
    %125 = arith.addf %123, %124 : vector<8x128xf32>
    %126 = math.tanh %125 : vector<8x128xf32>
    %127 = arith.index_cast %c5_i32 : i32 to index
    %c0_53 = arith.constant 0 : index
    %c0_54 = arith.constant 0 : index
    %128 = vector.load %arg7[%127, %c0_53, %c0_54] : memref<8x8x128xf32, #tpu.memory_space<vmem>>, vector<1x8x128xf32>
    %129 = vector.shape_cast %128 : vector<1x8x128xf32> to vector<8x128xf32>
    %130 = vector.shape_cast %126 : vector<8x128xf32> to vector<1x8x128xf32>
    tpu.vector_store %arg7[%127, %c0_53, %c0_54], %130 {strides = array<i32>} : memref<8x8x128xf32, #tpu.memory_space<vmem>>, vector<1x8x128xf32>,
    %c6_i32 = arith.constant 6 : i32
    %131 = arith.index_cast %c6_i32 : i32 to index
    %c0_55 = arith.constant 0 : index
    %c0_56 = arith.constant 0 : index
    %132 = vector.load %arg2[%131, %c0_55, %c0_56] : memref<8x8x128xbf16, #tpu.memory_space<vmem>>, vector<1x8x128xbf16>
    %133 = vector.shape_cast %132 : vector<1x8x128xbf16> to vector<8x128xbf16>
    %134 = arith.extf %133 : vector<8x128xbf16> to vector<8x128xf32>
    %135 = arith.truncf %118 : vector<8x128xf32> to vector<8x128xbf16>
    %cst_57 = arith.constant dense<0.000000e+00> : vector<8x128xf32>
    %136 = tpu.matmul %135, %3, %cst_57 {dimension_numbers = #tpu.dot_dimension_numbers<[1], [0], [0], [1], [0, 0, 1, 1], [], []>} : vector<8x128xbf16>, vector<128x128xbf16>, vector<8x128xf32> -> vector<8x128xf32>
    %137 = arith.addf %134, %136 : vector<8x128xf32>
    %138 = math.tanh %137 : vector<8x128xf32>
    %139 = arith.truncf %138 : vector<8x128xf32> to vector<8x128xbf16>
    %cst_58 = arith.constant dense<0.000000e+00> : vector<8x128xf32>
    %140 = tpu.matmul %139, %4, %cst_58 {dimension_numbers = #tpu.dot_dimension_numbers<[1], [0], [0], [1], [0, 0, 1, 1], [], []>} : vector<8x128xbf16>, vector<128x128xbf16>, vector<8x128xf32> -> vector<8x128xf32>
    %141 = arith.truncf %126 : vector<8x128xf32> to vector<8x128xbf16>
    %cst_59 = arith.constant dense<0.000000e+00> : vector<8x128xf32>
    %142 = tpu.matmul %141, %5, %cst_59 {dimension_numbers = #tpu.dot_dimension_numbers<[1], [0], [0], [1], [0, 0, 1, 1], [], []>} : vector<8x128xbf16>, vector<128x128xbf16>, vector<8x128xf32> -> vector<8x128xf32>
    %143 = arith.addf %140, %142 : vector<8x128xf32>
    %144 = vector.broadcast %6 : vector<1x128xf32> to vector<8x128xf32>
    %145 = arith.addf %143, %144 : vector<8x128xf32>
    %146 = math.tanh %145 : vector<8x128xf32>
    %147 = arith.index_cast %c6_i32 : i32 to index
    %c0_60 = arith.constant 0 : index
    %c0_61 = arith.constant 0 : index
    %148 = vector.load %arg7[%147, %c0_60, %c0_61] : memref<8x8x128xf32, #tpu.memory_space<vmem>>, vector<1x8x128xf32>
    %149 = vector.shape_cast %148 : vector<1x8x128xf32> to vector<8x128xf32>
    %150 = vector.shape_cast %146 : vector<8x128xf32> to vector<1x8x128xf32>
    tpu.vector_store %arg7[%147, %c0_60, %c0_61], %150 {strides = array<i32>} : memref<8x8x128xf32, #tpu.memory_space<vmem>>, vector<1x8x128xf32>,
    %c7_i32 = arith.constant 7 : i32
    %151 = arith.index_cast %c7_i32 : i32 to index
    %c0_62 = arith.constant 0 : index
    %c0_63 = arith.constant 0 : index
    %152 = vector.load %arg2[%151, %c0_62, %c0_63] : memref<8x8x128xbf16, #tpu.memory_space<vmem>>, vector<1x8x128xbf16>
    %153 = vector.shape_cast %152 : vector<1x8x128xbf16> to vector<8x128xbf16>
    %154 = arith.extf %153 : vector<8x128xbf16> to vector<8x128xf32>
    %155 = arith.truncf %138 : vector<8x128xf32> to vector<8x128xbf16>
    %cst_64 = arith.constant dense<0.000000e+00> : vector<8x128xf32>
    %156 = tpu.matmul %155, %3, %cst_64 {dimension_numbers = #tpu.dot_dimension_numbers<[1], [0], [0], [1], [0, 0, 1, 1], [], []>} : vector<8x128xbf16>, vector<128x128xbf16>, vector<8x128xf32> -> vector<8x128xf32>
    %157 = arith.addf %154, %156 : vector<8x128xf32>
    %158 = math.tanh %157 : vector<8x128xf32>
    %159 = arith.truncf %158 : vector<8x128xf32> to vector<8x128xbf16>
    %cst_65 = arith.constant dense<0.000000e+00> : vector<8x128xf32>
    %160 = tpu.matmul %159, %4, %cst_65 {dimension_numbers = #tpu.dot_dimension_numbers<[1], [0], [0], [1], [0, 0, 1, 1], [], []>} : vector<8x128xbf16>, vector<128x128xbf16>, vector<8x128xf32> -> vector<8x128xf32>
    %161 = arith.truncf %146 : vector<8x128xf32> to vector<8x128xbf16>
    %cst_66 = arith.constant dense<0.000000e+00> : vector<8x128xf32>
    %162 = tpu.matmul %161, %5, %cst_66 {dimension_numbers = #tpu.dot_dimension_numbers<[1], [0], [0], [1], [0, 0, 1, 1], [], []>} : vector<8x128xbf16>, vector<128x128xbf16>, vector<8x128xf32> -> vector<8x128xf32>
    %163 = arith.addf %160, %162 : vector<8x128xf32>
    %164 = vector.broadcast %6 : vector<1x128xf32> to vector<8x128xf32>
    %165 = arith.addf %163, %164 : vector<8x128xf32>
    %166 = math.tanh %165 : vector<8x128xf32>
    %167 = arith.index_cast %c7_i32 : i32 to index
    %c0_67 = arith.constant 0 : index
    %c0_68 = arith.constant 0 : index
    %168 = vector.load %arg7[%167, %c0_67, %c0_68] : memref<8x8x128xf32, #tpu.memory_space<vmem>>, vector<1x8x128xf32>
    %169 = vector.shape_cast %168 : vector<1x8x128xf32> to vector<8x128xf32>
    %170 = vector.shape_cast %166 : vector<8x128xf32> to vector<1x8x128xf32>
    tpu.vector_store %arg7[%167, %c0_67, %c0_68], %170 {strides = array<i32>} : memref<8x8x128xf32, #tpu.memory_space<vmem>>, vector<1x8x128xf32>,
    %c8_i32 = arith.constant 8 : i32
    %c0_69 = arith.constant 0 : index
    %c0_70 = arith.constant 0 : index
    %c0_71 = arith.constant 0 : index
    %171 = vector.load %arg8[%c0_69, %c0_70, %c0_71] : memref<2x8x128xf32, #tpu.memory_space<vmem>>, vector<1x8x128xf32>
    %172 = vector.shape_cast %171 : vector<1x8x128xf32> to vector<8x128xf32>
    %173 = vector.shape_cast %158 : vector<8x128xf32> to vector<1x8x128xf32>
    tpu.vector_store %arg8[%c0_69, %c0_70, %c0_71], %173 {strides = array<i32>} : memref<2x8x128xf32, #tpu.memory_space<vmem>>, vector<1x8x128xf32>,
    %c1_72 = arith.constant 1 : index
    %c0_73 = arith.constant 0 : index
    %c0_74 = arith.constant 0 : index
    %174 = vector.load %arg8[%c1_72, %c0_73, %c0_74] : memref<2x8x128xf32, #tpu.memory_space<vmem>>, vector<1x8x128xf32>
    %175 = vector.shape_cast %174 : vector<1x8x128xf32> to vector<8x128xf32>
    %176 = vector.shape_cast %166 : vector<8x128xf32> to vector<1x8x128xf32>
    tpu.vector_store %arg8[%c1_72, %c0_73, %c0_74], %176 {strides = array<i32>} : memref<2x8x128xf32, #tpu.memory_space<vmem>>, vector<1x8x128xf32>,
    return
  }
  func.func @transform_0(%arg0: i32, %arg1: i32) -> (i32, i32, i32) {
    %c0_i32 = arith.constant 0 : i32
    %c0_i32_0 = arith.constant 0 : i32
    return %arg1, %arg0, %c0_i32 : i32, i32, i32
  }
  func.func @transform_1(%arg0: i32, %arg1: i32) -> (i32, i32) {
    %c0_i32 = arith.constant 0 : i32
    %c0_i32_0 = arith.constant 0 : i32
    %c0_i32_1 = arith.constant 0 : i32
    return %c0_i32, %c0_i32_0 : i32, i32
  }
  func.func @transform_2(%arg0: i32, %arg1: i32) -> (i32, i32) {
    %c0_i32 = arith.constant 0 : i32
    %c0_i32_0 = arith.constant 0 : i32
    %c0_i32_1 = arith.constant 0 : i32
    return %c0_i32, %c0_i32_0 : i32, i32
  }
  func.func @transform_3(%arg0: i32, %arg1: i32) -> (i32, i32) {
    %c0_i32 = arith.constant 0 : i32
    %c0_i32_0 = arith.constant 0 : i32
    %c0_i32_1 = arith.constant 0 : i32
    return %c0_i32, %c0_i32_0 : i32, i32
  }
  func.func @transform_4(%arg0: i32, %arg1: i32) -> (i32, i32) {
    %c0_i32 = arith.constant 0 : i32
    %c0_i32_0 = arith.constant 0 : i32
    %c0_i32_1 = arith.constant 0 : i32
    return %c0_i32, %c0_i32_0 : i32, i32
  }
  func.func @transform_5(%arg0: i32, %arg1: i32) -> (i32, i32, i32) {
    %c0_i32 = arith.constant 0 : i32
    %c0_i32_0 = arith.constant 0 : i32
    return %arg1, %arg0, %c0_i32 : i32, i32, i32
  }
  func.func @transform_6(%arg0: i32, %arg1: i32) -> (i32, i32, i32) {
    %c0_i32 = arith.constant 0 : i32
    %c0_i32_0 = arith.constant 0 : i32
    %c0_i32_1 = arith.constant 0 : i32
    return %c0_i32, %arg0, %c0_i32_0 : i32, i32, i32
  }
}

</mosaic_0001>

<bundles_post_ra>
// kernel: tpu_custom_call.1
= control target key start
LH: loop header
LB: loop body
LE: loop exit
PB: predicated region body
PF: predicated region fallthrough
CT: control target
= control target key end

     0   :  { %12 = vsyncpa [#allocation3], 0  ;;  %s2970_s0 = inlined_call_operand.hbm [shape: bf16[8,8,128], index: 0, kind: input, shape index: {}]   ;;  %s2971_s1 = inlined_call_operand.hbm [shape: bf16[128,128], index: 1, kind: input, shape index: {}]   ;;  %s2972_s2 = inlined_call_operand.hbm [shape: bf16[128,128], index: 2, kind: input, shape index: {}]   ;;  %s2973_s3 = inlined_call_operand.hbm [shape: bf16[128,128], index: 3, kind: input, shape index: {}]   ;;  %s2974_s4 = inlined_call_operand.vmem [shape: f32[1,128], index: 4, kind: input, shape index: {}]   ;;  %s2975_s5 = inlined_call_operand.hbm [shape: f32[8,8,128], index: 5, kind: output, shape index: {0}]   ;;  %s2976_s6 = inlined_call_operand.hbm [shape: f32[2,8,128], index: 6, kind: output, shape index: {1}]  }
   0x1   :  { %13 = vsyncpa [#allocation6], 0 }
   0x2   :  { %14 = vsyncpa [#allocation9], 0 }
   0x3   :  { %15 = vsyncpa [#allocation4], 0 }
   0x4   :  { %16 = vsyncpa [#allocation12], 0  ;;  %s2325_s21 = smov [#allocation5]   ;;  %s2326_s23 = smov [#allocation2]  }
   0x5   :  { %s34_s22 = sshll.u32 %s2325_s21, 4  ;;  %s22_s24 = sshll.u32 %s2326_s23, 4  ;;  %s35_s22 = int_to_ptr.vmem [resolvable:$true] %s34_s22  ;;  %s2373_s24 = int_to_ptr.vmem [resolvable:$true] %s22_s24 }
   0x6   :  { %s2183_s27 = scalar_lea.hbm %s2971_s1, 1024 }
   0x7   :  { %p2184_p0 = scmp.ne.s32.totalorder %s2971_s1, %s2183_s27  ;;  %p2187_p1 = scmp.lt.u32.totalorder %s2183_s27, %s2971_s1 }
   0x9   :  { %p2189_p2 = pnand %p2187_p1, %p2184_p0 }
   0xb   :  { %2192 = shalt.err (!%p2189_p2)
}
   0xc   :  { %s2193_s8 = scalar_lea.vmem %s35_s22, 1024  ;;  %p2198_p4 = scmp.lt.s32.totalorder %s35_s22, %s35_s22 }
   0xd   :  { %p2194_p3 = scmp.ne.s32.totalorder %s35_s22, %s2193_s8  ;;  %p2199_p5 = scmp.lt.s32.totalorder %s2193_s8, %s2193_s8 }
   0xf   :  { %p2200_p6 = por %p2199_p5, %p2198_p4 }
  0x11   :  { %p2201_p7 = pnand %p2200_p6, %p2194_p3 }
  0x13   :  { %2204 = shalt.err (!%p2201_p7)
}
  0x14   :  { %s2327_s9 = smov 64   ;;  %s2328_s10 = smov 4  }
  0x15   :  { %40 = dma.hbm_to_vmem [thread:$0]  %s2971_s1, 1024, %s35_s22, [#allocation6], %s2327_s9, %s2327_s9, %s2328_s10  }
  0x16   :  { %s2205_s15 = scalar_lea.hbm %s2970_s0, 512 }
  0x17   :  { %p2206_p8 = scmp.ne.s32.totalorder %s2970_s0, %s2205_s15  ;;  %p2209_p9 = scmp.lt.u32.totalorder %s2205_s15, %s2970_s0 }
  0x19   :  { %p2211_p10 = pnand %p2209_p9, %p2206_p8 }
  0x1b   :  { %2214 = shalt.err (!%p2211_p10)
}
  0x1c   :  { %s2215_s20 = scalar_lea.vmem %s2373_s24, 512  ;;  %p2220_p12 = scmp.lt.s32.totalorder %s2373_s24, %s2373_s24 }
  0x1d   :  { %p2216_p11 = scmp.ne.s32.totalorder %s2373_s24, %s2215_s20  ;;  %p2221_p13 = scmp.lt.s32.totalorder %s2215_s20, %s2215_s20 }
  0x1f   :  { %p2222_p0 = por %p2221_p13, %p2220_p12 }
  0x21   :  { %p2223_p1 = pnand %p2222_p0, %p2216_p11 }
  0x23   :  { %2226 = shalt.err (!%p2223_p1)
}
  0x24   :  { %28 = dma.hbm_to_vmem [thread:$0]  %s2970_s0, 512, %s2373_s24, [#allocation3], %s2327_s9, %s2327_s9, %s2328_s10  }
  0x25   :  { %s2329_s22 = smov [#allocation7]   ;;  %s2330_s25 = smov [#allocation8]  }
  0x26   :  { %s46_s23 = sshll.u32 %s2329_s22, 4  ;;  %s58_s26 = sshll.u32 %s2330_s25, 4  ;;  %s47_s23 = int_to_ptr.vmem [resolvable:$true] %s46_s23  ;;  %s2410_s26 = int_to_ptr.vmem [resolvable:$true] %s58_s26 }
  0x27   :  { %s2227_s29 = scalar_lea.hbm %s2972_s2, 1024 }
  0x28   :  { %p2228_p2 = scmp.ne.s32.totalorder %s2972_s2, %s2227_s29  ;;  %p2231_p3 = scmp.lt.u32.totalorder %s2227_s29, %s2972_s2 }
  0x2a   :  { %p2233_p4 = pnand %p2231_p3, %p2228_p2 }
  0x2c   :  { %2236 = shalt.err (!%p2233_p4)
}
  0x2d   :  { %s2237_s0 = scalar_lea.vmem %s47_s23, 1024  ;;  %p2242_p6 = scmp.lt.s32.totalorder %s47_s23, %s47_s23 }
  0x2e   :  { %p2238_p5 = scmp.ne.s32.totalorder %s47_s23, %s2237_s0  ;;  %p2243_p7 = scmp.lt.s32.totalorder %s2237_s0, %s2237_s0 }
  0x30   :  { %p2244_p8 = por %p2243_p7, %p2242_p6 }
  0x32   :  { %p2245_p9 = pnand %p2244_p8, %p2238_p5 }
  0x34   :  { %2248 = shalt.err (!%p2245_p9)
}
  0x35   :  { %52 = dma.hbm_to_vmem [thread:$0]  %s2972_s2, 1024, %s47_s23, [#allocation6], %s2327_s9, %s2327_s9, %s2328_s10  }
  0x36   :  { %s2249_s15 = scalar_lea.hbm %s2973_s3, 1024 }
  0x37   :  { %p2250_p10 = scmp.ne.s32.totalorder %s2973_s3, %s2249_s15  ;;  %p2253_p11 = scmp.lt.u32.totalorder %s2249_s15, %s2973_s3 }
  0x39   :  { %p2255_p12 = pnand %p2253_p11, %p2250_p10 }
  0x3b   :  { %2258 = shalt.err (!%p2255_p12)
}
  0x3c   :  { %s2259_s20 = scalar_lea.vmem %s2410_s26, 1024  ;;  %p2264_p0 = scmp.lt.s32.totalorder %s2410_s26, %s2410_s26 }
  0x3d   :  { %p2260_p13 = scmp.ne.s32.totalorder %s2410_s26, %s2259_s20  ;;  %p2265_p1 = scmp.lt.s32.totalorder %s2259_s20, %s2259_s20 }
  0x3f   :  { %p2266_p2 = por %p2265_p1, %p2264_p0 }
  0x41   :  { %p2267_p3 = pnand %p2266_p2, %p2260_p13 }
  0x43   :  { %2270 = shalt.err (!%p2267_p3)
}
  0x44   :  { %64 = dma.hbm_to_vmem [thread:$0]  %s2973_s3, 1024, %s2410_s26, [#allocation9], %s2327_s9, %s2327_s9, %s2328_s10  }
  0x45   :  { %2315 = dma.done.wait [#allocation3], 512  }
  0x46   :  { %2316 = vsyncadd [#allocation3], 4294966784 }
  0x47   :  { %2317 = dma.done.wait [#allocation6], 2048  }
  0x48   :  { %2318 = vsyncadd [#allocation6], 4294965248 }
  0x49   :  { %2319 = dma.done.wait [#allocation9], 1024  }
  0x4a   :  { %2320 = vsyncadd [#allocation9], 4294966272  ;;  %v2331_v0 = vmov 0.0   ;;  %vm2332_vm0 = vmmov 0   ;;  %v2453_v1 = vld [vmem:[#allocation5] sm:$0xff]   ;;  %v2456_v2 = vld [vmem:[#allocation5 + $0x8] sm:$0xff]  }
  0x4b   :  { %1613 = vmatprep.subr.bf16.mxu0 %v2331_v0  ;;  %1629 = vmatprep.mubr.msk.bf16.mxu0 %vm2332_vm0, %v2331_v0  ;;  %v2460_v3 = vld [vmem:[#allocation5 + $0x10] sm:$0xff]   ;;  %v2463_v4 = vld [vmem:[#allocation8] sm:$0xff]   ;;  %v2465_v5 = vld [vmem:[#allocation5 + $0x18] sm:$0xff]   ;;  %v2333_v17 = vmov 0.0|0.0   ;;  %s2335_s21 = smov [#allocation11]  }
  0x4c   :  { %1633 = vmatprep.subr.bf16.mxu1 %v2331_v0  ;;  %1649 = vmatprep.mubr.msk.bf16.mxu1 %vm2332_vm0, %v2331_v0  ;;  %v2469_v6 = vld [vmem:[#allocation8 + $0x8] sm:$0xff]   ;;  %v2473_v7 = vld [vmem:[#allocation5 + $0x20] sm:$0xff]   ;;  %v2477_v8 = vld [vmem:[#allocation8 + $0x10] sm:$0xff]   ;;  %s1354_s22 = sshll.u32 %s2335_s21, 4  ;;  %s2939_s22 = int_to_ptr.vmem [resolvable:$true] %s1354_s22 }
  0x4d   :  { %1614 = vmatpush3.bf16.msra.mxu0 %v2453_v1  ;;  %1634 = vmatpush3.bf16.msra.mxu1 %v2463_v4  ;;  %v2481_v9 = vld [vmem:[#allocation5 + $0x28] sm:$0xff]   ;;  %v2485_v10 = vld [vmem:[#allocation8 + $0x18] sm:$0xff]   ;;  %v2489_v11 = vld [vmem:[#allocation5 + $0x30] sm:$0xff]  }
  0x4e   :  { %1615 = vmatprep.subr.bf16.mxu0 %v2331_v0  ;;  %1635 = vmatprep.subr.bf16.mxu1 %v2331_v0  ;;  %v2491_v12 = vld [vmem:[#allocation8 + $0x20] sm:$0xff]   ;;  %v2498_v13 = vld [vmem:[#allocation5 + $0x38] sm:$0xff]   ;;  %v2501_v14 = vld [vmem:[#allocation8 + $0x28] sm:$0xff]  }
  0x4f   :  { %v2507_v15 = vld [vmem:[#allocation8 + $0x30] sm:$0xff]   ;;  %v2509_v16 = vld [vmem:[#allocation7] sm:$0xff]   ;;  %v2514_v18 = vld [vmem:[#allocation8 + $0x38] sm:$0xff]  }
  0x50   :  { %v2517_v19 = vld [vmem:[#allocation7 + $0x8] sm:$0xff]   ;;  %v2525_v20 = vld [vmem:[#allocation7 + $0x10] sm:$0xff]   ;;  %v2531_v21 = vld [vmem:[#allocation7 + $0x18] sm:$0xff]  }
  0x51   :  { %1616 = vmatpush3.bf16.msra.mxu0 %v2456_v2  ;;  %1636 = vmatpush3.bf16.msra.mxu1 %v2469_v6  ;;  %v2553_v22 = vld [vmem:[#allocation7 + $0x20] sm:$0xff]   ;;  %v2557_v23 = vld [vmem:[#allocation7 + $0x28] sm:$0xff]   ;;  %v2561_v24 = vld [vmem:[#allocation7 + $0x30] sm:$0xff]  }
  0x52   :  { %1617 = vmatprep.subr.bf16.mxu0 %v2331_v0  ;;  %1637 = vmatprep.subr.bf16.mxu1 %v2331_v0  ;;  %v2565_v25 = vld [vmem:[#allocation7 + $0x38] sm:$0xff]   ;;  %v138_v26 = vld [vmem:[#allocation2] sm:$0xff]  }
  0x53   :  { %v139_v27 = vunpack.c.l.bf16 %v138_v26  ;;  %v420_v39 = vunpack.c.h.bf16 %v138_v26  ;;  %v2608_v40 = vld [vmem:[%s2974_s4] ss:$0 sm:$0xff]  ;;  %s2334_s4 = smov [#allocation10]  }
  0x54   :  { %s1342_s10 = sshll.u32 %s2334_s4, 4  ;;  %s1343_s10 = int_to_ptr.vmem [resolvable:$true] %s1342_s10 }
  0x55   :  { %1618 = vmatpush3.bf16.msra.mxu0 %v2460_v3  ;;  %1638 = vmatpush3.bf16.msra.mxu1 %v2477_v8  ;;  %s2271_s23 = scalar_lea.vmem %s1343_s10, 1024  ;;  %p2276_p5 = scmp.lt.s32.totalorder %s1343_s10, %s1343_s10 }
  0x56   :  { %1619 = vmatprep.subr.bf16.mxu0 %v2331_v0  ;;  %1639 = vmatprep.subr.bf16.mxu1 %v2331_v0  ;;  %p2272_p4 = scmp.ne.s32.totalorder %s1343_s10, %s2271_s23  ;;  %p2277_p6 = scmp.lt.s32.totalorder %s2271_s23, %s2271_s23 }
  0x58   :  { %p2278_p7 = por %p2277_p6, %p2276_p5 }
  0x59   :  { %1620 = vmatpush3.bf16.msra.mxu0 %v2465_v5  ;;  %1640 = vmatpush3.bf16.msra.mxu1 %v2485_v10 }
  0x5a   :  { %1621 = vmatprep.subr.bf16.mxu0 %v2331_v0  ;;  %1641 = vmatprep.subr.bf16.mxu1 %v2331_v0  ;;  %p2279_p8 = pnand %p2278_p7, %p2272_p4 }
  0x5d   :  { %1622 = vmatpush3.bf16.msra.mxu0 %v2473_v7  ;;  %1642 = vmatpush3.bf16.msra.mxu1 %v2491_v12 }
  0x5e   :  { %1623 = vmatprep.subr.bf16.mxu0 %v2331_v0  ;;  %1643 = vmatprep.subr.bf16.mxu1 %v2331_v0 }
  0x61   :  { %1624 = vmatpush3.bf16.msra.mxu0 %v2481_v9  ;;  %1644 = vmatpush3.bf16.msra.mxu1 %v2501_v14 }
  0x62   :  { %1625 = vmatprep.subr.bf16.mxu0 %v2331_v0  ;;  %1645 = vmatprep.subr.bf16.mxu1 %v2331_v0 }
  0x65   :  { %1626 = vmatpush3.bf16.msra.mxu0 %v2489_v11  ;;  %1646 = vmatpush3.bf16.msra.mxu1 %v2507_v15 }
  0x66   :  { %1627 = vmatprep.subr.bf16.mxu0 %v2331_v0  ;;  %1647 = vmatprep.subr.bf16.mxu1 %v2331_v0 }
  0x69   :  { %1628 = vmatpush3.bf16.msra.mxu0 %v2498_v13  ;;  %1648 = vmatpush3.bf16.msra.mxu1 %v2514_v18 }
  0x6a   :  { %1653 = vmatprep.subr.bf16.mxu0 %v2331_v0  ;;  %1673 = vmatprep.subr.bf16.mxu1 %v2331_v0 }
  0x6c   :  { %1630 = vmatmul.mubr.bf16.vlgmr.msra.gmra.mrb[0].mxu0 %v2333_v17  ;;  %1650 = vmatmul.mubr.bf16.vlgmr.msra.gmra.mrb[0].mxu1 %v2333_v17 }
  0x6d   :  { %1654 = vmatpush3.bf16.msra.mxu0 %v2509_v16  ;;  %1669 = vmatprep.mubr.msk.bf16.mxu0 %vm2332_vm0, %v2331_v0 }
  0x6e   :  { %1655 = vmatprep.subr.bf16.mxu0 %v2331_v0  ;;  %1674 = vmatpush3.bf16.msra.mxu1 %v2453_v1 }
  0x6f   :  { %1675 = vmatprep.subr.bf16.mxu1 %v2331_v0  ;;  %1689 = vmatprep.mubr.msk.bf16.mxu1 %vm2332_vm0, %v2331_v0 }
  0x71   :  { %1656 = vmatpush3.bf16.msra.mxu0 %v2517_v19 }
  0x72   :  { %1657 = vmatprep.subr.bf16.mxu0 %v2331_v0  ;;  %1676 = vmatpush3.bf16.msra.mxu1 %v2456_v2 }
  0x73   :  { %1677 = vmatprep.subr.bf16.mxu1 %v2331_v0 }
  0x75   :  { %1658 = vmatpush3.bf16.msra.mxu0 %v2525_v20 }
  0x76   :  { %1659 = vmatprep.subr.bf16.mxu0 %v2331_v0  ;;  %1678 = vmatpush3.bf16.msra.mxu1 %v2460_v3 }
  0x77   :  { %1679 = vmatprep.subr.bf16.mxu1 %v2331_v0 }
  0x79   :  { %1660 = vmatpush3.bf16.msra.mxu0 %v2531_v21 }
  0x7a   :  { %1661 = vmatprep.subr.bf16.mxu0 %v2331_v0  ;;  %1680 = vmatpush3.bf16.msra.mxu1 %v2465_v5 }
  0x7b   :  { %1681 = vmatprep.subr.bf16.mxu1 %v2331_v0 }
  0x7d   :  { %1662 = vmatpush3.bf16.msra.mxu0 %v2553_v22 }
  0x7e   :  { %1682 = vmatpush3.bf16.msra.mxu1 %v2473_v7  ;;  %1663 = vmatprep.subr.bf16.mxu0 %v2331_v0 }
  0x7f   :  { %1683 = vmatprep.subr.bf16.mxu1 %v2331_v0 }
  0x81   :  { %1664 = vmatpush3.bf16.msra.mxu0 %v2557_v23 }
  0x82   :  { %1684 = vmatpush3.bf16.msra.mxu1 %v2481_v9  ;;  %1665 = vmatprep.subr.bf16.mxu0 %v2331_v0 }
  0x83   :  { %1685 = vmatprep.subr.bf16.mxu1 %v2331_v0 }
  0x85   :  { %1666 = vmatpush3.bf16.msra.mxu0 %v2561_v24 }
  0x86   :  { %1686 = vmatpush3.bf16.msra.mxu1 %v2489_v11  ;;  %1667 = vmatprep.subr.bf16.mxu0 %v2331_v0 }
  0x87   :  { %1687 = vmatprep.subr.bf16.mxu1 %v2331_v0 }
  0x89   :  { %1668 = vmatpush3.bf16.msra.mxu0 %v2565_v25 }
  0x8a   :  { %1688 = vmatpush3.bf16.msra.mxu1 %v2498_v13  ;;  %1693 = vmatprep.subr.bf16.mxu0 %v2331_v0 }
  0x8b   :  { %1713 = vmatprep.subr.bf16.mxu1 %v2331_v0 }
 0x13f   :  { %v223_v28 = vpop.f32.mrb[0].mxu0  ;;  %v315_v33 = vpop.f32.mrb[0].mxu1 }
 0x140   :  { %v229_v29 = vadd.f32 %v223_v28, %v139_v27  ;;  %v1631_v30 = vpop.f32.mrb[1].mxu0  ;;  %v1651_v34 = vpop.f32.mrb[1].mxu1 }
 0x141   :  { %v226_v31 = vpop.f32.mrb[2].mxu0  ;;  %v318_v35 = vpop.f32.mrb[2].mxu1 }
 0x142   :  { %2129 = vtanh.f32 %v229_v29  ;;  %v1632_v32 = vpop.f32.mrb[3].mxu0  ;;  %v1652_v36 = vpop.f32.mrb[3].mxu1  ;;  %v2672_v29 = vld [vmem:[#allocation2 + $0x8] sm:$0xff]  }
 0x143   :  { %v551_v30 = vunpack.c.l.bf16 %v2672_v29 }
 0x14c   :  { %v2130_v37 = vpop.eup %2129 }
 0x14d   :  { %v231_v38 = vpack.c.bf16 %v2130_v37, %v2130_v37 }
 0x14f   :  { %1670 = vmatmul.mubr.bf16.vlgmr.msra.gmra.mrb[4].mxu0 %v231_v38  ;;  %1690 = vmatmul.mubr.bf16.vlgmr.msra.gmra.mrb[4].mxu1 %v231_v38 }
 0x150   :  { %1714 = vmatpush3.bf16.msra.mxu1 %v2509_v16  ;;  %1694 = vmatpush3.bf16.msra.mxu0 %v2463_v4 }
 0x151   :  { %1715 = vmatprep.subr.bf16.mxu1 %v2331_v0  ;;  %1695 = vmatprep.subr.bf16.mxu0 %v2331_v0 }
 0x152   :  { %1729 = vmatprep.mubr.msk.bf16.mxu1 %vm2332_vm0, %v2331_v0  ;;  %1709 = vmatprep.mubr.msk.bf16.mxu0 %vm2332_vm0, %v2331_v0 }
 0x154   :  { %1716 = vmatpush3.bf16.msra.mxu1 %v2517_v19  ;;  %1696 = vmatpush3.bf16.msra.mxu0 %v2469_v6 }
 0x155   :  { %1717 = vmatprep.subr.bf16.mxu1 %v2331_v0  ;;  %1697 = vmatprep.subr.bf16.mxu0 %v2331_v0 }
 0x158   :  { %1718 = vmatpush3.bf16.msra.mxu1 %v2525_v20  ;;  %1698 = vmatpush3.bf16.msra.mxu0 %v2477_v8 }
 0x159   :  { %1719 = vmatprep.subr.bf16.mxu1 %v2331_v0  ;;  %1699 = vmatprep.subr.bf16.mxu0 %v2331_v0 }
 0x15c   :  { %1720 = vmatpush3.bf16.msra.mxu1 %v2531_v21  ;;  %1700 = vmatpush3.bf16.msra.mxu0 %v2485_v10 }
 0x15d   :  { %1721 = vmatprep.subr.bf16.mxu1 %v2331_v0  ;;  %1701 = vmatprep.subr.bf16.mxu0 %v2331_v0 }
 0x160   :  { %1722 = vmatpush3.bf16.msra.mxu1 %v2553_v22  ;;  %1702 = vmatpush3.bf16.msra.mxu0 %v2491_v12 }
 0x161   :  { %1723 = vmatprep.subr.bf16.mxu1 %v2331_v0  ;;  %1703 = vmatprep.subr.bf16.mxu0 %v2331_v0 }
 0x164   :  { %1724 = vmatpush3.bf16.msra.mxu1 %v2557_v23  ;;  %1704 = vmatpush3.bf16.msra.mxu0 %v2501_v14 }
 0x165   :  { %1725 = vmatprep.subr.bf16.mxu1 %v2331_v0  ;;  %1705 = vmatprep.subr.bf16.mxu0 %v2331_v0 }
 0x168   :  { %1726 = vmatpush3.bf16.msra.mxu1 %v2561_v24  ;;  %1706 = vmatpush3.bf16.msra.mxu0 %v2507_v15 }
 0x169   :  { %1727 = vmatprep.subr.bf16.mxu1 %v2331_v0  ;;  %1707 = vmatprep.subr.bf16.mxu0 %v2331_v0 }
 0x16c   :  { %1728 = vmatpush3.bf16.msra.mxu1 %v2565_v25  ;;  %1708 = vmatpush3.bf16.msra.mxu0 %v2514_v18 }
 0x16d   :  { %1733 = vmatprep.subr.bf16.mxu0 %v2331_v0  ;;  %1753 = vmatprep.subr.bf16.mxu1 %v2331_v0 }
 0x222   :  { %v403_v41 = vpop.f32.mrb[4].mxu0  ;;  %v455_v42 = vpop.f32.mrb[4].mxu1 }
 0x223   :  { %v404_v43 = vadd.f32 %v403_v41, %v315_v33  ;;  %v461_v44 = vadd.f32 %v455_v42, %v420_v39  ;;  %v1671_v45 = vpop.f32.mrb[5].mxu0  ;;  %v1691_v46 = vpop.f32.mrb[5].mxu1 }
 0x224   :  { %v406_v47 = vpop.f32.mrb[6].mxu0  ;;  %v458_v48 = vpop.f32.mrb[6].mxu1 }
 0x225   :  { %v415_v49 = vadd.f32 %v2608_v40, %v404_v43  ;;  %2131 = vtanh.f32 %v461_v44  ;;  %v1672_v50 = vpop.f32.mrb[7].mxu0  ;;  %v1692_v51 = vpop.f32.mrb[7].mxu1  ;;  %v682_v43 = vunpack.c.h.bf16 %v2672_v29 }
 0x227   :  { %2133 = vtanh.f32 %v415_v49 }
 0x22f   :  { %v2132_v52 = vpop.eup %2131 }
 0x230   :  { %v463_v53 = vpack.c.bf16 %v2132_v52, %v2132_v52 }
 0x231   :  { %v2134_v54 = vpop.eup %2133 }
 0x232   :  { %417 = vst [vmem:[#allocation10] sm:$0xff] %v2134_v54  ;;  %1730 = vmatmul.mubr.bf16.vlgmr.msra.gmra.mrb[8].mxu1 %v463_v53  ;;  %v464_v55 = vpack.c.bf16 %v2134_v54, %v2134_v54 }
 0x233   :  { %1754 = vmatpush3.bf16.msra.mxu1 %v2463_v4  ;;  %1769 = vmatprep.mubr.msk.bf16.mxu1 %vm2332_vm0, %v2331_v0 }
 0x234   :  { %1710 = vmatmul.mubr.bf16.vlgmr.msra.gmra.mrb[8].mxu0 %v464_v55  ;;  %1755 = vmatprep.subr.bf16.mxu1 %v2331_v0 }
 0x235   :  { %1734 = vmatpush3.bf16.msra.mxu0 %v2453_v1  ;;  %1749 = vmatprep.mubr.msk.bf16.mxu0 %vm2332_vm0, %v2331_v0 }
 0x236   :  { %1735 = vmatprep.subr.bf16.mxu0 %v2331_v0 }
 0x237   :  { %1756 = vmatpush3.bf16.msra.mxu1 %v2469_v6 }
 0x238   :  { %1757 = vmatprep.subr.bf16.mxu1 %v2331_v0 }
 0x239   :  { %1736 = vmatpush3.bf16.msra.mxu0 %v2456_v2 }
 0x23a   :  { %1737 = vmatprep.subr.bf16.mxu0 %v2331_v0 }
 0x23b   :  { %1758 = vmatpush3.bf16.msra.mxu1 %v2477_v8 }
 0x23c   :  { %1759 = vmatprep.subr.bf16.mxu1 %v2331_v0 }
 0x23d   :  { %1738 = vmatpush3.bf16.msra.mxu0 %v2460_v3 }
 0x23e   :  { %1739 = vmatprep.subr.bf16.mxu0 %v2331_v0 }
 0x23f   :  { %1760 = vmatpush3.bf16.msra.mxu1 %v2485_v10 }
 0x240   :  { %1761 = vmatprep.subr.bf16.mxu1 %v2331_v0 }
 0x241   :  { %1740 = vmatpush3.bf16.msra.mxu0 %v2465_v5 }
 0x242   :  { %1741 = vmatprep.subr.bf16.mxu0 %v2331_v0 }
 0x243   :  { %1762 = vmatpush3.bf16.msra.mxu1 %v2491_v12 }
 0x244   :  { %1763 = vmatprep.subr.bf16.mxu1 %v2331_v0 }
 0x245   :  { %1742 = vmatpush3.bf16.msra.mxu0 %v2473_v7 }
 0x246   :  { %1743 = vmatprep.subr.bf16.mxu0 %v2331_v0 }
 0x247   :  { %1764 = vmatpush3.bf16.msra.mxu1 %v2501_v14 }
 0x248   :  { %1765 = vmatprep.subr.bf16.mxu1 %v2331_v0 }
 0x249   :  { %1744 = vmatpush3.bf16.msra.mxu0 %v2481_v9 }
 0x24a   :  { %1745 = vmatprep.subr.bf16.mxu0 %v2331_v0 }
 0x24b   :  { %1766 = vmatpush3.bf16.msra.mxu1 %v2507_v15 }
 0x24c   :  { %1767 = vmatprep.subr.bf16.mxu1 %v2331_v0 }
 0x24d   :  { %1746 = vmatpush3.bf16.msra.mxu0 %v2489_v11 }
 0x24e   :  { %1747 = vmatprep.subr.bf16.mxu0 %v2331_v0 }
 0x24f   :  { %1768 = vmatpush3.bf16.msra.mxu1 %v2514_v18 }
 0x250   :  { %1793 = vmatprep.subr.bf16.mxu1 %v2331_v0 }
 0x251   :  { %1748 = vmatpush3.bf16.msra.mxu0 %v2498_v13 }
 0x252   :  { %1773 = vmatprep.subr.bf16.mxu0 %v2331_v0 }
 0x254   :  { %1750 = vmatmul.mubr.bf16.vlgmr.msra.gmra.mrb[12].mxu0 %v463_v53 }
 0x255   :  { %1774 = vmatpush3.bf16.msra.mxu0 %v2509_v16  ;;  %1789 = vmatprep.mubr.msk.bf16.mxu0 %vm2332_vm0, %v2331_v0 }
 0x256   :  { %1775 = vmatprep.subr.bf16.mxu0 %v2331_v0 }
 0x259   :  { %1776 = vmatpush3.bf16.msra.mxu0 %v2517_v19 }
 0x25a   :  { %1777 = vmatprep.subr.bf16.mxu0 %v2331_v0 }
 0x25d   :  { %1778 = vmatpush3.bf16.msra.mxu0 %v2525_v20 }
 0x25e   :  { %1779 = vmatprep.subr.bf16.mxu0 %v2331_v0 }
 0x261   :  { %1780 = vmatpush3.bf16.msra.mxu0 %v2531_v21 }
 0x262   :  { %1781 = vmatprep.subr.bf16.mxu0 %v2331_v0 }
 0x265   :  { %1782 = vmatpush3.bf16.msra.mxu0 %v2553_v22 }
 0x266   :  { %1783 = vmatprep.subr.bf16.mxu0 %v2331_v0 }
 0x269   :  { %1784 = vmatpush3.bf16.msra.mxu0 %v2557_v23 }
 0x26a   :  { %1785 = vmatprep.subr.bf16.mxu0 %v2331_v0 }
 0x26d   :  { %1786 = vmatpush3.bf16.msra.mxu0 %v2561_v24 }
 0x26e   :  { %1787 = vmatprep.subr.bf16.mxu0 %v2331_v0 }
 0x271   :  { %1788 = vmatpush3.bf16.msra.mxu0 %v2565_v25 }
 0x272   :  { %1813 = vmatprep.subr.bf16.mxu0 %v2331_v0 }
 0x305   :  { %v539_v56 = vpop.f32.mrb[8].mxu1 }
 0x306   :  { %v1731_v57 = vpop.f32.mrb[9].mxu1 }
 0x307   :  { %v499_v58 = vpop.f32.mrb[8].mxu0  ;;  %v542_v59 = vpop.f32.mrb[10].mxu1 }
 0x308   :  { %v540_v60 = vadd.f32 %v539_v56, %v499_v58  ;;  %v1711_v61 = vpop.f32.mrb[9].mxu0  ;;  %v1732_v62 = vpop.f32.mrb[11].mxu1 }
 0x309   :  { %v502_v63 = vpop.f32.mrb[10].mxu0 }
 0x30a   :  { %v545_v17 = vadd.f32 %v2608_v40, %v540_v60  ;;  %v1712_v26 = vpop.f32.mrb[11].mxu0 }
 0x30c   :  { %2135 = vtanh.f32 %v545_v17 }
 0x316   :  { %v2136_v27 = vpop.eup %2135 }
 0x317   :  { %548 = vst [vmem:[#allocation10 + $0x8] sm:$0xff] %v2136_v27  ;;  %v595_v28 = vpack.c.bf16 %v2136_v27, %v2136_v27 }
 0x319   :  { %1770 = vmatmul.mubr.bf16.vlgmr.msra.gmra.mrb[12].mxu1 %v595_v28 }
 0x31a   :  { %1794 = vmatpush3.bf16.msra.mxu1 %v2453_v1  ;;  %1809 = vmatprep.mubr.msk.bf16.mxu1 %vm2332_vm0, %v2331_v0 }
 0x31b   :  { %1795 = vmatprep.subr.bf16.mxu1 %v2331_v0 }
 0x31e   :  { %1796 = vmatpush3.bf16.msra.mxu1 %v2456_v2 }
 0x31f   :  { %1797 = vmatprep.subr.bf16.mxu1 %v2331_v0 }
 0x322   :  { %1798 = vmatpush3.bf16.msra.mxu1 %v2460_v3 }
 0x323   :  { %1799 = vmatprep.subr.bf16.mxu1 %v2331_v0 }
 0x326   :  { %1800 = vmatpush3.bf16.msra.mxu1 %v2465_v5 }
 0x327   :  { %v586_v31 = vpop.f32.mrb[12].mxu0  ;;  %1801 = vmatprep.subr.bf16.mxu1 %v2331_v0 }
 0x328   :  { %v592_v32 = vadd.f32 %v586_v31, %v551_v30  ;;  %v1751_v33 = vpop.f32.mrb[13].mxu0 }
 0x329   :  { %v589_v34 = vpop.f32.mrb[14].mxu0 }
 0x32a   :  { %2137 = vtanh.f32 %v592_v32  ;;  %v1752_v35 = vpop.f32.mrb[15].mxu0  ;;  %1802 = vmatpush3.bf16.msra.mxu1 %v2473_v7  ;;  %v2786_v32 = vld [vmem:[#allocation2 + $0x10] sm:$0xff]  }
 0x32b   :  { %1803 = vmatprep.subr.bf16.mxu1 %v2331_v0  ;;  %v813_v33 = vunpack.c.l.bf16 %v2786_v32 }
 0x32e   :  { %1804 = vmatpush3.bf16.msra.mxu1 %v2481_v9 }
 0x32f   :  { %1805 = vmatprep.subr.bf16.mxu1 %v2331_v0 }
 0x332   :  { %1806 = vmatpush3.bf16.msra.mxu1 %v2489_v11 }
 0x333   :  { %1807 = vmatprep.subr.bf16.mxu1 %v2331_v0 }
 0x334   :  { %v2138_v36 = vpop.eup %2137 }
 0x335   :  { %v594_v37 = vpack.c.bf16 %v2138_v36, %v2138_v36 }
 0x336   :  { %1808 = vmatpush3.bf16.msra.mxu1 %v2498_v13 }
 0x337   :  { %1790 = vmatmul.mubr.bf16.vlgmr.msra.gmra.mrb[16].mxu0 %v594_v37  ;;  %1833 = vmatprep.subr.bf16.mxu1 %v2331_v0 }
 0x338   :  { %1814 = vmatpush3.bf16.msra.mxu0 %v2463_v4  ;;  %1829 = vmatprep.mubr.msk.bf16.mxu0 %vm2332_vm0, %v2331_v0 }
 0x339   :  { %1810 = vmatmul.mubr.bf16.vlgmr.msra.gmra.mrb[16].mxu1 %v594_v37  ;;  %1815 = vmatprep.subr.bf16.mxu0 %v2331_v0 }
 0x33a   :  { %1834 = vmatpush3.bf16.msra.mxu1 %v2509_v16  ;;  %1849 = vmatprep.mubr.msk.bf16.mxu1 %vm2332_vm0, %v2331_v0 }
 0x33b   :  { %1835 = vmatprep.subr.bf16.mxu1 %v2331_v0 }
 0x33c   :  { %1816 = vmatpush3.bf16.msra.mxu0 %v2469_v6 }
 0x33d   :  { %1817 = vmatprep.subr.bf16.mxu0 %v2331_v0 }
 0x33e   :  { %1836 = vmatpush3.bf16.msra.mxu1 %v2517_v19 }
 0x33f   :  { %1837 = vmatprep.subr.bf16.mxu1 %v2331_v0 }
 0x340   :  { %1818 = vmatpush3.bf16.msra.mxu0 %v2477_v8 }
 0x341   :  { %1819 = vmatprep.subr.bf16.mxu0 %v2331_v0 }
 0x342   :  { %1838 = vmatpush3.bf16.msra.mxu1 %v2525_v20 }
 0x343   :  { %1839 = vmatprep.subr.bf16.mxu1 %v2331_v0 }
 0x344   :  { %1820 = vmatpush3.bf16.msra.mxu0 %v2485_v10 }
 0x345   :  { %1821 = vmatprep.subr.bf16.mxu0 %v2331_v0 }
 0x346   :  { %1840 = vmatpush3.bf16.msra.mxu1 %v2531_v21 }
 0x347   :  { %1841 = vmatprep.subr.bf16.mxu1 %v2331_v0 }
 0x348   :  { %1822 = vmatpush3.bf16.msra.mxu0 %v2491_v12 }
 0x349   :  { %1823 = vmatprep.subr.bf16.mxu0 %v2331_v0 }
 0x34a   :  { %1842 = vmatpush3.bf16.msra.mxu1 %v2553_v22 }
 0x34b   :  { %1843 = vmatprep.subr.bf16.mxu1 %v2331_v0 }
 0x34c   :  { %1824 = vmatpush3.bf16.msra.mxu0 %v2501_v14 }
 0x34d   :  { %1825 = vmatprep.subr.bf16.mxu0 %v2331_v0 }
 0x34e   :  { %1844 = vmatpush3.bf16.msra.mxu1 %v2557_v23 }
 0x34f   :  { %1845 = vmatprep.subr.bf16.mxu1 %v2331_v0 }
 0x350   :  { %1826 = vmatpush3.bf16.msra.mxu0 %v2507_v15 }
 0x351   :  { %1827 = vmatprep.subr.bf16.mxu0 %v2331_v0 }
 0x352   :  { %1846 = vmatpush3.bf16.msra.mxu1 %v2561_v24 }
 0x353   :  { %1847 = vmatprep.subr.bf16.mxu1 %v2331_v0 }
 0x354   :  { %1828 = vmatpush3.bf16.msra.mxu0 %v2514_v18 }
 0x355   :  { %1853 = vmatprep.subr.bf16.mxu0 %v2331_v0 }
 0x356   :  { %1848 = vmatpush3.bf16.msra.mxu1 %v2565_v25 }
 0x357   :  { %1873 = vmatprep.subr.bf16.mxu1 %v2331_v0 }
 0x3ec   :  { %v630_v38 = vpop.f32.mrb[12].mxu1 }
 0x3ed   :  { %v1771_v39 = vpop.f32.mrb[13].mxu1 }
 0x3ee   :  { %v633_v41 = vpop.f32.mrb[14].mxu1 }
 0x3ef   :  { %v1772_v42 = vpop.f32.mrb[15].mxu1 }
 0x40a   :  { %v670_v44 = vpop.f32.mrb[16].mxu0 }
 0x40b   :  { %v671_v45 = vadd.f32 %v670_v44, %v630_v38  ;;  %v1791_v46 = vpop.f32.mrb[17].mxu0  ;;  %v944_v44 = vunpack.c.h.bf16 %v2786_v32  ;;  %v2171_v32 = vld [vmem:[#allocation8 + $0x8] sm:$0xff]  }
 0x40c   :  { %v673_v47 = vpop.f32.mrb[18].mxu0  ;;  %v717_v48 = vpop.f32.mrb[16].mxu1 }
 0x40d   :  { %v676_v49 = vadd.f32 %v2608_v40, %v671_v45  ;;  %v723_v50 = vadd.f32 %v717_v48, %v682_v43  ;;  %v1792_v51 = vpop.f32.mrb[19].mxu0  ;;  %v1811_v52 = vpop.f32.mrb[17].mxu1 }
 0x40e   :  { %v720_v53 = vpop.f32.mrb[18].mxu1 }
 0x40f   :  { %2139 = vtanh.f32 %v676_v49  ;;  %v1812_v54 = vpop.f32.mrb[19].mxu1 }
 0x410   :  { %2141 = vtanh.f32 %v723_v50 }
 0x419   :  { %v2140_v55 = vpop.eup %2139 }
 0x41a   :  { %v2142_v56 = vpop.eup %2141  ;;  %679 = vst [vmem:[#allocation10 + $0x10] sm:$0xff] %v2140_v55  ;;  %v726_v57 = vpack.c.bf16 %v2140_v55, %v2140_v55 }
 0x41b   :  { %v725_v58 = vpack.c.bf16 %v2142_v56, %v2142_v56 }
 0x41c   :  { %1830 = vmatmul.mubr.bf16.vlgmr.msra.gmra.mrb[20].mxu0 %v726_v57 }
 0x41d   :  { %1850 = vmatmul.mubr.bf16.vlgmr.msra.gmra.mrb[20].mxu1 %v725_v58  ;;  %1854 = vmatpush3.bf16.msra.mxu0 %v2453_v1 }
 0x41e   :  { %1855 = vmatprep.subr.bf16.mxu0 %v2331_v0  ;;  %1869 = vmatprep.mubr.msk.bf16.mxu0 %vm2332_vm0, %v2331_v0 }
 0x41f   :  { %1874 = vmatpush3.bf16.msra.mxu1 %v2463_v4  ;;  %1889 = vmatprep.mubr.msk.bf16.mxu1 %vm2332_vm0, %v2331_v0 }
 0x420   :  { %1875 = vmatprep.subr.bf16.mxu1 %v2331_v0 }
 0x421   :  { %1856 = vmatpush3.bf16.msra.mxu0 %v2456_v2 }
 0x422   :  { %1857 = vmatprep.subr.bf16.mxu0 %v2331_v0 }
 0x423   :  { %1876 = vmatpush3.bf16.msra.mxu1 %v2469_v6 }
 0x424   :  { %1877 = vmatprep.subr.bf16.mxu1 %v2331_v0 }
 0x425   :  { %1858 = vmatpush3.bf16.msra.mxu0 %v2460_v3 }
 0x426   :  { %1859 = vmatprep.subr.bf16.mxu0 %v2331_v0 }
 0x427   :  { %1878 = vmatpush3.bf16.msra.mxu1 %v2477_v8 }
 0x428   :  { %1879 = vmatprep.subr.bf16.mxu1 %v2331_v0 }
 0x429   :  { %1860 = vmatpush3.bf16.msra.mxu0 %v2465_v5 }
 0x42a   :  { %1861 = vmatprep.subr.bf16.mxu0 %v2331_v0 }
 0x42b   :  { %1880 = vmatpush3.bf16.msra.mxu1 %v2485_v10 }
 0x42c   :  { %1881 = vmatprep.subr.bf16.mxu1 %v2331_v0 }
 0x42d   :  { %1862 = vmatpush3.bf16.msra.mxu0 %v2473_v7 }
 0x42e   :  { %1863 = vmatprep.subr.bf16.mxu0 %v2331_v0 }
 0x42f   :  { %1882 = vmatpush3.bf16.msra.mxu1 %v2491_v12 }
 0x430   :  { %1883 = vmatprep.subr.bf16.mxu1 %v2331_v0 }
 0x431   :  { %1864 = vmatpush3.bf16.msra.mxu0 %v2481_v9 }
 0x432   :  { %1865 = vmatprep.subr.bf16.mxu0 %v2331_v0 }
 0x433   :  { %1884 = vmatpush3.bf16.msra.mxu1 %v2501_v14 }
 0x434   :  { %1885 = vmatprep.subr.bf16.mxu1 %v2331_v0 }
 0x435   :  { %1866 = vmatpush3.bf16.msra.mxu0 %v2489_v11 }
 0x436   :  { %1867 = vmatprep.subr.bf16.mxu0 %v2331_v0 }
 0x437   :  { %1886 = vmatpush3.bf16.msra.mxu1 %v2507_v15 }
 0x438   :  { %1887 = vmatprep.subr.bf16.mxu1 %v2331_v0 }
 0x439   :  { %1868 = vmatpush3.bf16.msra.mxu0 %v2498_v13 }
 0x43a   :  { %1893 = vmatprep.subr.bf16.mxu0 %v2331_v0 }
 0x43b   :  { %1888 = vmatpush3.bf16.msra.mxu1 %v2514_v18 }
 0x43c   :  { %1870 = vmatmul.mubr.bf16.vlgmr.msra.gmra.mrb[24].mxu0 %v725_v58  ;;  %1913 = vmatprep.subr.bf16.mxu1 %v2331_v0 }
 0x43d   :  { %1894 = vmatpush3.bf16.msra.mxu0 %v2509_v16  ;;  %1909 = vmatprep.mubr.msk.bf16.mxu0 %vm2332_vm0, %v2331_v0 }
 0x43e   :  { %1895 = vmatprep.subr.bf16.mxu0 %v2331_v0 }
 0x441   :  { %1896 = vmatpush3.bf16.msra.mxu0 %v2517_v19 }
 0x442   :  { %1897 = vmatprep.subr.bf16.mxu0 %v2331_v0 }
 0x445   :  { %1898 = vmatpush3.bf16.msra.mxu0 %v2525_v20 }
 0x446   :  { %1899 = vmatprep.subr.bf16.mxu0 %v2331_v0 }
 0x449   :  { %1900 = vmatpush3.bf16.msra.mxu0 %v2531_v21 }
 0x44a   :  { %1901 = vmatprep.subr.bf16.mxu0 %v2331_v0 }
 0x44d   :  { %1902 = vmatpush3.bf16.msra.mxu0 %v2553_v22 }
 0x44e   :  { %1903 = vmatprep.subr.bf16.mxu0 %v2331_v0 }
 0x451   :  { %1904 = vmatpush3.bf16.msra.mxu0 %v2557_v23 }
 0x452   :  { %1905 = vmatprep.subr.bf16.mxu0 %v2331_v0 }
 0x455   :  { %1906 = vmatpush3.bf16.msra.mxu0 %v2561_v24 }
 0x456   :  { %1907 = vmatprep.subr.bf16.mxu0 %v2331_v0 }
 0x459   :  { %1908 = vmatpush3.bf16.msra.mxu0 %v2565_v25 }
 0x45a   :  { %1933 = vmatprep.subr.bf16.mxu0 %v2331_v0 }
 0x4ef   :  { %v761_v59 = vpop.f32.mrb[20].mxu0 }
 0x4f0   :  { %v801_v60 = vpop.f32.mrb[20].mxu1  ;;  %v1831_v61 = vpop.f32.mrb[21].mxu0 }
 0x4f1   :  { %v802_v62 = vadd.f32 %v801_v60, %v761_v59  ;;  %v1851_v63 = vpop.f32.mrb[21].mxu1  ;;  %v764_v17 = vpop.f32.mrb[22].mxu0  ;;  %v2839_v59 = vld [vmem:[#allocation5] sm:$0xff]   ;;  %v2849_v60 = vld [vmem:[#allocation5 + $0x8] sm:$0xff]   ;;  %v2855_v61 = vld [vmem:[#allocation5 + $0x10] sm:$0xff]  }
 0x4f2   :  { %v804_v26 = vpop.f32.mrb[22].mxu1  ;;  %v1832_v27 = vpop.f32.mrb[23].mxu0  ;;  %v2165_v63 = vld [vmem:[#allocation5 + $0x20] sm:$0xff]   ;;  %v2166_v17 = vld [vmem:[#allocation5 + $0x28] sm:$0xff]  }
 0x4f3   :  { %v807_v28 = vadd.f32 %v2608_v40, %v802_v62  ;;  %v1852_v29 = vpop.f32.mrb[23].mxu1  ;;  %v2167_v26 = vld [vmem:[#allocation5 + $0x30] sm:$0xff]  }
 0x4f4   :  { %v2168_v29 = vld [vmem:[#allocation5 + $0x38] sm:$0xff]  }
 0x4f5   :  { %2143 = vtanh.f32 %v807_v28 }
 0x4ff   :  { %v2144_v30 = vpop.eup %2143 }
 0x500   :  { %810 = vst [vmem:[#allocation10 + $0x18] sm:$0xff] %v2144_v30  ;;  %v857_v31 = vpack.c.bf16 %v2144_v30, %v2144_v30  ;;  %v2169_v30 = vld [vmem:[#allocation8] sm:$0xff]  }
 0x502   :  { %1890 = vmatmul.mubr.bf16.vlgmr.msra.gmra.mrb[24].mxu1 %v857_v31  ;;  %v2170_v31 = vld [vmem:[#allocation7] sm:$0xff]  }
 0x503   :  { %1914 = vmatpush3.bf16.msra.mxu1 %v2453_v1  ;;  %1929 = vmatprep.mubr.msk.bf16.mxu1 %vm2332_vm0, %v2331_v0 }
 0x504   :  { %1915 = vmatprep.subr.bf16.mxu1 %v2331_v0 }
 0x507   :  { %1916 = vmatpush3.bf16.msra.mxu1 %v2456_v2 }
 0x508   :  { %1917 = vmatprep.subr.bf16.mxu1 %v2331_v0 }
 0x50b   :  { %1918 = vmatpush3.bf16.msra.mxu1 %v2460_v3 }
 0x50c   :  { %1919 = vmatprep.subr.bf16.mxu1 %v2331_v0 }
 0x50f   :  { %1920 = vmatpush3.bf16.msra.mxu1 %v2465_v5  ;;  %v848_v1 = vpop.f32.mrb[24].mxu0 }
 0x510   :  { %v854_v34 = vadd.f32 %v848_v1, %v813_v33  ;;  %v1871_v35 = vpop.f32.mrb[25].mxu0  ;;  %1921 = vmatprep.subr.bf16.mxu1 %v2331_v0  ;;  %v2172_v33 = vld [vmem:[#allocation7 + $0x8] sm:$0xff]   ;;  %v2173_v1 = vld [vmem:[#allocation8 + $0x10] sm:$0xff]  }
 0x511   :  { %v851_v36 = vpop.f32.mrb[26].mxu0  ;;  %v2175_v35 = vld [vmem:[#allocation8 + $0x18] sm:$0xff]  }
 0x512   :  { %2145 = vtanh.f32 %v854_v34  ;;  %v1872_v2 = vpop.f32.mrb[27].mxu0  ;;  %v2174_v34 = vld [vmem:[#allocation7 + $0x10] sm:$0xff]   ;;  %v2176_v36 = vld [vmem:[#allocation7 + $0x18] sm:$0xff]  }
 0x513   :  { %1922 = vmatpush3.bf16.msra.mxu1 %v2473_v7  ;;  %v2177_v2 = vld [vmem:[#allocation8 + $0x20] sm:$0xff]  }
 0x514   :  { %1923 = vmatprep.subr.bf16.mxu1 %v2331_v0 }
 0x517   :  { %1924 = vmatpush3.bf16.msra.mxu1 %v2481_v9 }
 0x518   :  { %1925 = vmatprep.subr.bf16.mxu1 %v2331_v0 }
 0x51b   :  { %1926 = vmatpush3.bf16.msra.mxu1 %v2489_v11 }
 0x51c   :  { %v2146_v3 = vpop.eup %2145  ;;  %1927 = vmatprep.subr.bf16.mxu1 %v2331_v0 }
 0x51d   :  { %v856_v37 = vpack.c.bf16 %v2146_v3, %v2146_v3  ;;  %v2178_v3 = vld [vmem:[#allocation8 + $0x28] sm:$0xff]  }
 0x51f   :  { %1928 = vmatpush3.bf16.msra.mxu1 %v2498_v13  ;;  %1910 = vmatmul.mubr.bf16.vlgmr.msra.gmra.mrb[28].mxu0 %v856_v37 }
 0x520   :  { %1934 = vmatpush3.bf16.msra.mxu0 %v2463_v4  ;;  %1953 = vmatprep.subr.bf16.mxu1 %v2331_v0 }
 0x521   :  { %1935 = vmatprep.subr.bf16.mxu0 %v2331_v0  ;;  %1949 = vmatprep.mubr.msk.bf16.mxu0 %vm2332_vm0, %v2331_v0 }
 0x522   :  { %1930 = vmatmul.mubr.bf16.vlgmr.msra.gmra.mrb[28].mxu1 %v856_v37  ;;  %v2179_v37 = vld [vmem:[#allocation8 + $0x30] sm:$0xff]  }
 0x523   :  { %1954 = vmatpush3.bf16.msra.mxu1 %v2509_v16  ;;  %1969 = vmatprep.mubr.msk.bf16.mxu1 %vm2332_vm0, %v2331_v0 }
 0x524   :  { %1936 = vmatpush3.bf16.msra.mxu0 %v2469_v6  ;;  %1955 = vmatprep.subr.bf16.mxu1 %v2331_v0 }
 0x525   :  { %1937 = vmatprep.subr.bf16.mxu0 %v2331_v0 }
 0x527   :  { %1956 = vmatpush3.bf16.msra.mxu1 %v2517_v19 }
 0x528   :  { %1938 = vmatpush3.bf16.msra.mxu0 %v2477_v8  ;;  %1957 = vmatprep.subr.bf16.mxu1 %v2331_v0 }
 0x529   :  { %1939 = vmatprep.subr.bf16.mxu0 %v2331_v0 }
 0x52b   :  { %1958 = vmatpush3.bf16.msra.mxu1 %v2525_v20 }
 0x52c   :  { %1940 = vmatpush3.bf16.msra.mxu0 %v2485_v10  ;;  %1959 = vmatprep.subr.bf16.mxu1 %v2331_v0 }
 0x52d   :  { %1941 = vmatprep.subr.bf16.mxu0 %v2331_v0 }
 0x52f   :  { %1960 = vmatpush3.bf16.msra.mxu1 %v2531_v21 }
 0x530   :  { %1942 = vmatpush3.bf16.msra.mxu0 %v2491_v12  ;;  %1961 = vmatprep.subr.bf16.mxu1 %v2331_v0 }
 0x531   :  { %1943 = vmatprep.subr.bf16.mxu0 %v2331_v0 }
 0x533   :  { %1962 = vmatpush3.bf16.msra.mxu1 %v2553_v22 }
 0x534   :  { %1944 = vmatpush3.bf16.msra.mxu0 %v2501_v14  ;;  %1963 = vmatprep.subr.bf16.mxu1 %v2331_v0 }
 0x535   :  { %1945 = vmatprep.subr.bf16.mxu0 %v2331_v0 }
 0x537   :  { %1964 = vmatpush3.bf16.msra.mxu1 %v2557_v23 }
 0x538   :  { %1946 = vmatpush3.bf16.msra.mxu0 %v2507_v15  ;;  %1965 = vmatprep.subr.bf16.mxu1 %v2331_v0 }
 0x539   :  { %1947 = vmatprep.subr.bf16.mxu0 %v2331_v0 }
 0x53b   :  { %1966 = vmatpush3.bf16.msra.mxu1 %v2561_v24 }
 0x53c   :  { %1948 = vmatpush3.bf16.msra.mxu0 %v2514_v18  ;;  %1967 = vmatprep.subr.bf16.mxu1 %v2331_v0 }
 0x53d   :  { %1973 = vmatprep.subr.bf16.mxu0 %v2331_v0 }
 0x53f   :  { %1968 = vmatpush3.bf16.msra.mxu1 %v2565_v25 }
 0x540   :  { %1993 = vmatprep.subr.bf16.mxu1 %v2331_v0 }
 0x5d5   :  { %v892_v38 = vpop.f32.mrb[24].mxu1 }
 0x5d6   :  { %v1891_v39 = vpop.f32.mrb[25].mxu1 }
 0x5d7   :  { %v895_v41 = vpop.f32.mrb[26].mxu1  ;;  %v2181_v39 = vld [vmem:[#allocation8 + $0x38] sm:$0xff]  }
 0x5d8   :  { %v1892_v42 = vpop.f32.mrb[27].mxu1 }
 0x5f2   :  { %v932_v43 = vpop.f32.mrb[28].mxu0 }
 0x5f3   :  { %v933_v45 = vadd.f32 %v932_v43, %v892_v38  ;;  %v1911_v46 = vpop.f32.mrb[29].mxu0  ;;  %v2180_v38 = vld [vmem:[#allocation7 + $0x30] sm:$0xff]  }
 0x5f4   :  { %v935_v47 = vpop.f32.mrb[30].mxu0 }
 0x5f5   :  { %v938_v48 = vadd.f32 %v2608_v40, %v933_v45  ;;  %v979_v49 = vpop.f32.mrb[28].mxu1  ;;  %v1912_v50 = vpop.f32.mrb[31].mxu0 }
 0x5f6   :  { %v985_v51 = vadd.f32 %v979_v49, %v944_v44  ;;  %v1931_v52 = vpop.f32.mrb[29].mxu1 }
 0x5f7   :  { %2147 = vtanh.f32 %v938_v48  ;;  %v982_v53 = vpop.f32.mrb[30].mxu1 }
 0x5f8   :  { %2149 = vtanh.f32 %v985_v51  ;;  %v1932_v54 = vpop.f32.mrb[31].mxu1 }
 0x601   :  { %v2148_v55 = vpop.eup %2147 }
 0x602   :  { %v2150_v56 = vpop.eup %2149  ;;  %941 = vst [vmem:[#allocation10 + $0x20] sm:$0xff] %v2148_v55  ;;  %v988_v57 = vpack.c.bf16 %v2148_v55, %v2148_v55 }
 0x603   :  { %v987_v58 = vpack.c.bf16 %v2150_v56, %v2150_v56 }
 0x604   :  { %1950 = vmatmul.mubr.bf16.vlgmr.msra.gmra.mrb[32].mxu0 %v988_v57 }
 0x605   :  { %1970 = vmatmul.mubr.bf16.vlgmr.msra.gmra.mrb[32].mxu1 %v987_v58  ;;  %1974 = vmatpush3.bf16.msra.mxu0 %v2839_v59 }
 0x606   :  { %1975 = vmatprep.subr.bf16.mxu0 %v2331_v0  ;;  %1989 = vmatprep.mubr.msk.bf16.mxu0 %vm2332_vm0, %v2331_v0 }
 0x607   :  { %1994 = vmatpush3.bf16.msra.mxu1 %v2463_v4  ;;  %2009 = vmatprep.mubr.msk.bf16.mxu1 %vm2332_vm0, %v2331_v0 }
 0x608   :  { %1995 = vmatprep.subr.bf16.mxu1 %v2331_v0 }
 0x609   :  { %1976 = vmatpush3.bf16.msra.mxu0 %v2849_v60 }
 0x60a   :  { %1977 = vmatprep.subr.bf16.mxu0 %v2331_v0 }
 0x60b   :  { %1996 = vmatpush3.bf16.msra.mxu1 %v2469_v6 }
 0x60c   :  { %1997 = vmatprep.subr.bf16.mxu1 %v2331_v0 }
 0x60d   :  { %1978 = vmatpush3.bf16.msra.mxu0 %v2855_v61 }
 0x60e   :  { %1979 = vmatprep.subr.bf16.mxu0 %v2331_v0 }
 0x60f   :  { %1998 = vmatpush3.bf16.msra.mxu1 %v2477_v8 }
 0x610   :  { %1999 = vmatprep.subr.bf16.mxu1 %v2331_v0 }
 0x611   :  { %1980 = vmatpush3.bf16.msra.mxu0 %v2465_v5 }
 0x612   :  { %1981 = vmatprep.subr.bf16.mxu0 %v2331_v0 }
 0x613   :  { %2000 = vmatpush3.bf16.msra.mxu1 %v2485_v10 }
 0x614   :  { %2001 = vmatprep.subr.bf16.mxu1 %v2331_v0 }
 0x615   :  { %1982 = vmatpush3.bf16.msra.mxu0 %v2473_v7 }
 0x616   :  { %1983 = vmatprep.subr.bf16.mxu0 %v2331_v0 }
 0x617   :  { %2002 = vmatpush3.bf16.msra.mxu1 %v2491_v12 }
 0x618   :  { %2003 = vmatprep.subr.bf16.mxu1 %v2331_v0 }
 0x619   :  { %1984 = vmatpush3.bf16.msra.mxu0 %v2481_v9 }
 0x61a   :  { %1985 = vmatprep.subr.bf16.mxu0 %v2331_v0 }
 0x61b   :  { %2004 = vmatpush3.bf16.msra.mxu1 %v2501_v14 }
 0x61c   :  { %2005 = vmatprep.subr.bf16.mxu1 %v2331_v0 }
 0x61d   :  { %1986 = vmatpush3.bf16.msra.mxu0 %v2489_v11 }
 0x61e   :  { %1987 = vmatprep.subr.bf16.mxu0 %v2331_v0 }
 0x61f   :  { %2006 = vmatpush3.bf16.msra.mxu1 %v2507_v15 }
 0x620   :  { %2007 = vmatprep.subr.bf16.mxu1 %v2331_v0 }
 0x621   :  { %1988 = vmatpush3.bf16.msra.mxu0 %v2498_v13 }
 0x622   :  { %2013 = vmatprep.subr.bf16.mxu0 %v2331_v0 }
 0x623   :  { %2008 = vmatpush3.bf16.msra.mxu1 %v2514_v18 }
 0x624   :  { %1990 = vmatmul.mubr.bf16.vlgmr.msra.gmra.mrb[36].mxu0 %v987_v58  ;;  %2033 = vmatprep.subr.bf16.mxu1 %v2331_v0 }
 0x625   :  { %2014 = vmatpush3.bf16.msra.mxu0 %v2509_v16  ;;  %2029 = vmatprep.mubr.msk.bf16.mxu0 %vm2332_vm0, %v2331_v0  ;;  %v2906_v16 = vld [vmem:[#allocation2 + $0x18] sm:$0xff]  }
 0x626   :  { %2015 = vmatprep.subr.bf16.mxu0 %v2331_v0  ;;  %v1075_v18 = vunpack.c.l.bf16 %v2906_v16 }
 0x629   :  { %2016 = vmatpush3.bf16.msra.mxu0 %v2517_v19  ;;  %v2164_v19 = vld [vmem:[#allocation5 + $0x18] sm:$0xff]  }
 0x62a   :  { %2017 = vmatprep.subr.bf16.mxu0 %v2331_v0 }
 0x62d   :  { %2018 = vmatpush3.bf16.msra.mxu0 %v2525_v20 }
 0x62e   :  { %2019 = vmatprep.subr.bf16.mxu0 %v2331_v0 }
 0x631   :  { %2020 = vmatpush3.bf16.msra.mxu0 %v2531_v21 }
 0x632   :  { %2021 = vmatprep.subr.bf16.mxu0 %v2331_v0 }
 0x635   :  { %2022 = vmatpush3.bf16.msra.mxu0 %v2553_v22 }
 0x636   :  { %2023 = vmatprep.subr.bf16.mxu0 %v2331_v0 }
 0x639   :  { %2024 = vmatpush3.bf16.msra.mxu0 %v2557_v23 }
 0x63a   :  { %2025 = vmatprep.subr.bf16.mxu0 %v2331_v0 }
 0x63d   :  { %2026 = vmatpush3.bf16.msra.mxu0 %v2561_v24 }
 0x63e   :  { %2027 = vmatprep.subr.bf16.mxu0 %v2331_v0 }
 0x641   :  { %2028 = vmatpush3.bf16.msra.mxu0 %v2565_v25 }
 0x642   :  { %2053 = vmatprep.subr.bf16.mxu0 %v2331_v0 }
 0x6d7   :  { %v1023_v4 = vpop.f32.mrb[32].mxu0 }
 0x6d8   :  { %v1063_v5 = vpop.f32.mrb[32].mxu1  ;;  %v1951_v6 = vpop.f32.mrb[33].mxu0 }
 0x6d9   :  { %v1064_v7 = vadd.f32 %v1063_v5, %v1023_v4  ;;  %v1971_v8 = vpop.f32.mrb[33].mxu1  ;;  %v1026_v9 = vpop.f32.mrb[34].mxu0 }
 0x6da   :  { %v1066_v10 = vpop.f32.mrb[34].mxu1  ;;  %v1952_v11 = vpop.f32.mrb[35].mxu0 }
 0x6db   :  { %v1069_v12 = vadd.f32 %v2608_v40, %v1064_v7  ;;  %v1972_v13 = vpop.f32.mrb[35].mxu1 }
 0x6dd   :  { %2151 = vtanh.f32 %v1069_v12 }
 0x6e7   :  { %v2152_v14 = vpop.eup %2151 }
 0x6e8   :  { %1072 = vst [vmem:[#allocation10 + $0x28] sm:$0xff] %v2152_v14  ;;  %v1119_v15 = vpack.c.bf16 %v2152_v14, %v2152_v14 }
 0x6ea   :  { %2010 = vmatmul.mubr.bf16.vlgmr.msra.gmra.mrb[36].mxu1 %v1119_v15 }
 0x6eb   :  { %2034 = vmatpush3.bf16.msra.mxu1 %v2839_v59  ;;  %2049 = vmatprep.mubr.msk.bf16.mxu1 %vm2332_vm0, %v2331_v0 }
 0x6ec   :  { %2035 = vmatprep.subr.bf16.mxu1 %v2331_v0 }
 0x6ef   :  { %2036 = vmatpush3.bf16.msra.mxu1 %v2849_v60 }
 0x6f0   :  { %2037 = vmatprep.subr.bf16.mxu1 %v2331_v0 }
 0x6f3   :  { %2038 = vmatpush3.bf16.msra.mxu1 %v2855_v61 }
 0x6f4   :  { %2039 = vmatprep.subr.bf16.mxu1 %v2331_v0 }
 0x6f7   :  { %2040 = vmatpush3.bf16.msra.mxu1 %v2164_v19  ;;  %v1110_v20 = vpop.f32.mrb[36].mxu0 }
 0x6f8   :  { %v1116_v21 = vadd.f32 %v1110_v20, %v1075_v18  ;;  %v1991_v24 = vpop.f32.mrb[37].mxu0  ;;  %2041 = vmatprep.subr.bf16.mxu1 %v2331_v0 }
 0x6f9   :  { %v1113_v25 = vpop.f32.mrb[38].mxu0 }
 0x6fa   :  { %2153 = vtanh.f32 %v1116_v21  ;;  %v1992_v62 = vpop.f32.mrb[39].mxu0 }
 0x6fb   :  { %2042 = vmatpush3.bf16.msra.mxu1 %v2165_v63 }
 0x6fc   :  { %2043 = vmatprep.subr.bf16.mxu1 %v2331_v0 }
 0x6ff   :  { %2044 = vmatpush3.bf16.msra.mxu1 %v2166_v17 }
 0x700   :  { %2045 = vmatprep.subr.bf16.mxu1 %v2331_v0 }
 0x703   :  { %2046 = vmatpush3.bf16.msra.mxu1 %v2167_v26 }
 0x704   :  { %v2154_v27 = vpop.eup %2153  ;;  %2047 = vmatprep.subr.bf16.mxu1 %v2331_v0 }
 0x705   :  { %v1118_v28 = vpack.c.bf16 %v2154_v27, %v2154_v27 }
 0x707   :  { %2048 = vmatpush3.bf16.msra.mxu1 %v2168_v29  ;;  %2030 = vmatmul.mubr.bf16.vlgmr.msra.gmra.mrb[40].mxu0 %v1118_v28 }
 0x708   :  { %2073 = vmatprep.subr.bf16.mxu1 %v2331_v0  ;;  %2054 = vmatpush3.bf16.msra.mxu0 %v2169_v30 }
 0x709   :  { %2055 = vmatprep.subr.bf16.mxu0 %v2331_v0  ;;  %2069 = vmatprep.mubr.msk.bf16.mxu0 %vm2332_vm0, %v2331_v0 }
 0x70a   :  { %2050 = vmatmul.mubr.bf16.vlgmr.msra.gmra.mrb[40].mxu1 %v1118_v28 }
 0x70b   :  { %2074 = vmatpush3.bf16.msra.mxu1 %v2170_v31  ;;  %2089 = vmatprep.mubr.msk.bf16.mxu1 %vm2332_vm0, %v2331_v0 }
 0x70c   :  { %2075 = vmatprep.subr.bf16.mxu1 %v2331_v0  ;;  %2056 = vmatpush3.bf16.msra.mxu0 %v2171_v32 }
 0x70d   :  { %2057 = vmatprep.subr.bf16.mxu0 %v2331_v0 }
 0x70f   :  { %2076 = vmatpush3.bf16.msra.mxu1 %v2172_v33 }
 0x710   :  { %2077 = vmatprep.subr.bf16.mxu1 %v2331_v0  ;;  %2058 = vmatpush3.bf16.msra.mxu0 %v2173_v1 }
 0x711   :  { %2059 = vmatprep.subr.bf16.mxu0 %v2331_v0 }
 0x713   :  { %2078 = vmatpush3.bf16.msra.mxu1 %v2174_v34 }
 0x714   :  { %2079 = vmatprep.subr.bf16.mxu1 %v2331_v0  ;;  %2060 = vmatpush3.bf16.msra.mxu0 %v2175_v35 }
 0x715   :  { %2061 = vmatprep.subr.bf16.mxu0 %v2331_v0 }
 0x717   :  { %2080 = vmatpush3.bf16.msra.mxu1 %v2176_v36 }
 0x718   :  { %2081 = vmatprep.subr.bf16.mxu1 %v2331_v0  ;;  %2062 = vmatpush3.bf16.msra.mxu0 %v2177_v2 }
 0x719   :  { %2063 = vmatprep.subr.bf16.mxu0 %v2331_v0 }
 0x71b   :  { %2082 = vmatpush3.bf16.msra.mxu1 %v2553_v22  ;;  %v2182_v22 = vld [vmem:[#allocation7 + $0x38] sm:$0xff]  }
 0x71c   :  { %2083 = vmatprep.subr.bf16.mxu1 %v2331_v0  ;;  %2064 = vmatpush3.bf16.msra.mxu0 %v2178_v3 }
 0x71d   :  { %2065 = vmatprep.subr.bf16.mxu0 %v2331_v0 }
 0x71f   :  { %2084 = vmatpush3.bf16.msra.mxu1 %v2557_v23  ;;  %v1206_v23 = vunpack.c.h.bf16 %v2906_v16 }
 0x720   :  { %2085 = vmatprep.subr.bf16.mxu1 %v2331_v0  ;;  %2066 = vmatpush3.bf16.msra.mxu0 %v2179_v37 }
 0x721   :  { %2067 = vmatprep.subr.bf16.mxu0 %v2331_v0 }
 0x723   :  { %2086 = vmatpush3.bf16.msra.mxu1 %v2180_v38 }
 0x724   :  { %2087 = vmatprep.subr.bf16.mxu1 %v2331_v0  ;;  %2068 = vmatpush3.bf16.msra.mxu0 %v2181_v39 }
 0x727   :  { %2088 = vmatpush3.bf16.msra.mxu1 %v2182_v22 }
 0x7bd   :  { %v1154_v41 = vpop.f32.mrb[36].mxu1 }
 0x7be   :  { %v2011_v42 = vpop.f32.mrb[37].mxu1 }
 0x7bf   :  { %v1157_v43 = vpop.f32.mrb[38].mxu1 }
 0x7c0   :  { %v2012_v44 = vpop.f32.mrb[39].mxu1 }
 0x7da   :  { %v1194_v45 = vpop.f32.mrb[40].mxu0 }
 0x7db   :  { %v1195_v46 = vadd.f32 %v1194_v45, %v1154_v41  ;;  %v2031_v47 = vpop.f32.mrb[41].mxu0 }
 0x7dc   :  { %v1197_v48 = vpop.f32.mrb[42].mxu0 }
 0x7dd   :  { %v1200_v49 = vadd.f32 %v2608_v40, %v1195_v46  ;;  %v1241_v50 = vpop.f32.mrb[40].mxu1  ;;  %v2032_v51 = vpop.f32.mrb[43].mxu0 }
 0x7de   :  { %v1247_v52 = vadd.f32 %v1241_v50, %v1206_v23  ;;  %v2051_v0 = vpop.f32.mrb[41].mxu1 }
 0x7df   :  { %2155 = vtanh.f32 %v1200_v49  ;;  %v1244_v53 = vpop.f32.mrb[42].mxu1 }
 0x7e0   :  { %2157 = vtanh.f32 %v1247_v52  ;;  %v2052_v54 = vpop.f32.mrb[43].mxu1 }
 0x7e9   :  { %v2156_v55 = vpop.eup %2155 }
 0x7ea   :  { %v2158_v56 = vpop.eup %2157  ;;  %1203 = vst [vmem:[#allocation10 + $0x30] sm:$0xff] %v2156_v55  ;;  %v1250_v57 = vpack.c.bf16 %v2156_v55, %v2156_v55 }
 0x7eb   :  { %1335 = vst [vmem:[#allocation11] sm:$0xff] %v2158_v56  ;;  %v1249_v58 = vpack.c.bf16 %v2158_v56, %v2158_v56 }
 0x7ec   :  { %2070 = vmatmul.mubr.bf16.vlgmr.msra.gmra.mrb[44].mxu0 %v1250_v57 }
 0x7ed   :  { %2090 = vmatmul.mubr.bf16.vlgmr.msra.gmra.mrb[44].mxu1 %v1249_v58 }
 0x8bf   :  { %v1285_v59 = vpop.f32.mrb[44].mxu0 }
 0x8c0   :  { %v1325_v60 = vpop.f32.mrb[44].mxu1  ;;  %v2071_v61 = vpop.f32.mrb[45].mxu0 }
 0x8c1   :  { %v1326_v4 = vadd.f32 %v1325_v60, %v1285_v59  ;;  %v2091_v5 = vpop.f32.mrb[45].mxu1  ;;  %v1288_v6 = vpop.f32.mrb[46].mxu0 }
 0x8c2   :  { %v1328_v7 = vpop.f32.mrb[46].mxu1  ;;  %v2072_v8 = vpop.f32.mrb[47].mxu0 }
 0x8c3   :  { %v1331_v9 = vadd.f32 %v2608_v40, %v1326_v4  ;;  %v2092_v10 = vpop.f32.mrb[47].mxu1 }
 0x8c5   :  { %2159 = vtanh.f32 %v1331_v9 }
 0x8cf   :  { %v2160_v11 = vpop.eup %2159 }
 0x8d0   :  { %1334 = vst [vmem:[#allocation10 + $0x38] sm:$0xff] %v2160_v11  ;;  %1336 = vst [vmem:[#allocation11 + $0x8] sm:$0xff] %v2160_v11 }
 0x8d1   :  { %2282 = shalt.err (!%p2279_p8)
}
 0x8d2   :  { %s2283_s27 = scalar_lea.hbm %s2975_s5, 1024 }
 0x8d3   :  { %p2284_p9 = scmp.ne.s32.totalorder %s2975_s5, %s2283_s27  ;;  %p2287_p10 = scmp.lt.u32.totalorder %s2283_s27, %s2975_s5 }
 0x8d5   :  { %p2289_p11 = pnand %p2287_p10, %p2284_p9 }
 0x8d7   :  { %2292 = shalt.err (!%p2289_p11)
}
 0x8d8   :  { %s2336_s8 = smov 128   ;;  %s2337_s11 = smov 8  }
 0x8d9   :  { %1348 = dma.vmem_to_hbm [thread:$0]  %s1343_s10, 1024, %s2975_s5, [#allocation4], %s2336_s8, %s2336_s8, %s2337_s11  }
 0x8da   :  { %s2293_s12 = scalar_lea.vmem %s2939_s22, 256  ;;  %p2298_p13 = scmp.lt.s32.totalorder %s2939_s22, %s2939_s22 }
 0x8db   :  { %p2294_p12 = scmp.ne.s32.totalorder %s2939_s22, %s2293_s12  ;;  %p2299_p0 = scmp.lt.s32.totalorder %s2293_s12, %s2293_s12 }
 0x8dd   :  { %p2300_p1 = por %p2299_p0, %p2298_p13 }
 0x8df   :  { %p2301_p2 = pnand %p2300_p1, %p2294_p12 }
 0x8e1   :  { %2304 = shalt.err (!%p2301_p2)
}
 0x8e2   :  { %s2305_s15 = scalar_lea.hbm %s2976_s6, 256 }
 0x8e3   :  { %p2306_p3 = scmp.ne.s32.totalorder %s2976_s6, %s2305_s15  ;;  %p2309_p4 = scmp.lt.u32.totalorder %s2305_s15, %s2976_s6 }
 0x8e5   :  { %p2311_p5 = pnand %p2309_p4, %p2306_p3 }
 0x8e7   :  { %2314 = shalt.err (!%p2311_p5)
}
 0x8e8   :  { %1360 = dma.vmem_to_hbm [thread:$0]  %s2939_s22, 256, %s2976_s6, [#allocation12], %s2336_s8, %s2336_s8, %s2337_s11  }
 0x8e9   :  { %2321 = dma.done.wait [#allocation4], 1024  }
 0x8ea   :  { %2322 = vsyncadd [#allocation4], 4294966272 }
 0x8eb   :  { %2323 = dma.done.wait [#allocation12], 256  }
 0x8ec   :  { %2324 = vsyncadd [#allocation12], 4294967040 }
 0x8ed   :  { %1367 = vsyncpa [#allocation3], 1 }
 0x8ee   :  { %1368 = vsyncpa [#allocation6], 1 }
 0x8ef   :  { %1369 = vsyncpa [#allocation9], 1 }
 0x8f0   :  { %1370 = vsyncpa [#allocation4], 1 }
 0x8f1   :  { %1371 = vsyncpa [#allocation12], 1 }

</bundles_post_ra>
